<compile_context>
chip_gen: v6e
topology: v6e:2x2x1
jax: 0.10.0
libtpu: 0.0.40
codegen_flags: <defaults>
</compile_context>

<pallas_src>
import functools

import jax
import jax.numpy as jnp
from jax import lax
from jax.experimental import pallas as pl
from jax.experimental.pallas import tpu as pltpu


def _round_up(x, m):
    return (x + m - 1) // m * m


def _num_tensorcores():
    """Best-effort TensorCore count (2 on v7x-style megacore, else 1)."""
    try:
        return max(1, int(getattr(jax.devices()[0], "num_cores", 1)))
    except Exception:  # pragma: no cover - defensive
        return 1


def memn2n_kernel(q_ref, m_ref, ct_ref, hwt_ref, hb_ref, o_ref, u_scr,
                  *, hops, m_valid):
    """MemN2N hops (at c==0, cached in u_scr) + candidate-tile scoring.

    q_ref  : [tB, E]      summed query embedding (u_0), bf16
    m_ref  : [tB, Mp, E]  summed story embeddings (padded slots are zero), bf16
    ct_ref : [E, tC]      summed candidate embeddings, pre-transposed, bf16
    hwt_ref: [E, E]       linear_H weight, pre-transposed (y = x @ W), bf16
    hb_ref : [1, E]       linear_H bias, f32
    o_ref  : [tB, tC]     output logits, f32
    u_scr  : [tB, E]      f32 scratch holding u after the hops
    """
    # The hop recurrence is independent of the candidate tile: run it once per
    # batch tile (c == 0) and reuse the cached u for every candidate tile.
    @pl.when(pl.program_id(1) == 0)
    def _run_hops():
        u = q_ref[...].astype(jnp.float32)                    # [tB, E]
        m = m_ref[...].astype(jnp.float32)                    # [tB, Mp, E]
        hwt = hwt_ref[...]                                    # [E, E] bf16
        # Hoist the bias broadcast out of the unrolled hop loop.
        hb = jnp.broadcast_to(hb_ref[...], u.shape)           # [tB, E] f32
        # Mask for the sublane-padded memory slots (M -> Mp multiple of 8).
        slot = lax.broadcasted_iota(jnp.int32, (u.shape[0], m.shape[1]), 1)
        slot_ok = slot < m_valid                              # [tB, Mp]

        for _ in range(hops):
            # attention[b, s] = sum_e m[b, s, e] * u[b, e]
            # VPU multiply + XLU lane-reduce (MXU would run N=1 matvecs here).
            att = jnp.sum(m * u[:, None, :], axis=2)          # [tB, Mp]
            att = jnp.where(slot_ok, att, jnp.float32(-1e30))
            # softmax over the memory axis, f32
            att = att - jnp.max(att, axis=1, keepdims=True)
            p = jnp.exp(att)
            denom = jnp.sum(p, axis=1, keepdims=True)
            p = p * pl.reciprocal(denom, approx=True)         # EUP slot
            # attn_stories[b, e] = sum_s p[b, s] * m[b, s, e]  (VPU + XLU)
            attn_stories = jnp.sum(p[:, :, None] * m, axis=1)  # [tB, E]
            # new_u = linear_H(u) + attn_stories (nonlin is None); MXU GEMM.
            u = (jnp.dot(u.astype(jnp.bfloat16), hwt,
                         preferred_element_type=jnp.float32)
                 + hb + attn_stories)                          # [tB, E] f32
        u_scr[...] = u

    # logits = u @ candidates^T for this candidate tile (lane-dense store).
    o_ref[...] = jnp.dot(u_scr[...].astype(jnp.bfloat16), ct_ref[...],
                         preferred_element_type=jnp.float32)


def prepare_params(embed_A, embed_W, candidates_vec, H_w, H_b):
    """Precompute the static, padded/transposed kernel operands once.

    Returns (embed_A_pad[f32, V x E_pad], ct_p[bf16, E_pad x C_pad],
             hwt_p[bf16, E_pad x E_pad], hb_p[f32, 1 x E_pad], n_candidates).
    """
    V, E = embed_A.shape
    E_pad = _round_up(E, 128)
    C = int(candidates_vec.shape[0])
    C_pad = _round_up(C, 128)

    # Pre-pad the embedding table on the E axis so the per-call gather+sum
    # natively produce E_pad-wide outputs (no extra HBM copy of m_sum).
    embed_A_pad = jnp.pad(embed_A.astype(jnp.float32),
                          ((0, 0), (0, E_pad - E)))
    # Candidate scoring matrix: sum over sentence tokens, transposed -> [E, C].
    c_sum = jnp.sum(embed_W[candidates_vec], axis=1).astype(jnp.float32)
    ct_p = jnp.pad(c_sum.T, ((0, E_pad - E), (0, C_pad - C))
                   ).astype(jnp.bfloat16)
    # linear_H weight pre-transposed to "y = x @ W" layout.
    hwt_p = jnp.pad(H_w.T.astype(jnp.float32),
                    ((0, E_pad - E), (0, E_pad - E))).astype(jnp.bfloat16)
    hb_p = jnp.pad(H_b.astype(jnp.float32), (0, E_pad - E)).reshape(1, E_pad)
    return embed_A_pad, ct_p, hwt_p, hb_p, C


@functools.partial(jax.jit, static_argnames=("n_candidates", "hops"))
def memn2n_forward(stories, query, embed_A_pad, ct_p, hwt_p, hb_p,
                   *, n_candidates, hops=3):
    # ---- glue (plain JAX): embedding lookups + sentence-axis sums ----
    # TODO(synk): embedding gather+sum kept in JAX; at production sizes this
    # materialized [B,M,S,E] gather dominates HBM traffic and would be the
    # next thing to fuse (scalar-prefetch DMA-gather kernel).
    q_sum = jnp.sum(embed_A_pad[query], axis=1)      # [B, E_pad] f32
    m_sum = jnp.sum(embed_A_pad[stories], axis=2)    # [B, M, E_pad] f32

    B = query.shape[0]
    M = stories.shape[1]
    E_pad = embed_A_pad.shape[1]
    C_pad = ct_p.shape[1]

    # ---- tiling ----
    M_pad = _round_up(M, 8)                 # sublane-aligned memory axis
    b8 = _round_up(B, 8)
    n_cores = _num_tensorcores()
    tb = min(128, b8)
    if n_cores > 1 and b8 >= 16:
        # v7x: make sure the "parallel" batch axis has >= n_cores grid steps.
        tb = min(tb, max(8, _round_up(b8 // n_cores, 8)))
    B_pad = _round_up(b8, tb)

    # Candidate-axis tile sized against a conservative VMEM budget (fits the
    # 16 MiB v5e default scoped limit; also safe for v7x's smaller VMEM).
    def _footprint(tc_):
        return (2 * tb * E_pad * 2            # q (bf16, double-buffered)
                + 2 * tb * M_pad * E_pad * 2  # m (bf16)
                + 2 * E_pad * tc_ * 2         # cand^T tile (bf16)
                + 2 * E_pad * E_pad * 2       # H^T (bf16)
                + 2 * E_pad * 4               # bias (f32)
                + 2 * tb * tc_ * 4            # out tile (f32)
                + tb * E_pad * 4)             # u scratch (f32)

    vmem_budget = 12 * 1024 * 1024
    tc = C_pad
    while tc > 128 and _footprint(tc) > vmem_budget:
        tc = _round_up(max(128, tc // 2), 128)
    C_grid = _round_up(C_pad, tc)

    # ---- per-call operand padding (jnp.pad fuses with the sums above) ----
    q_p = jnp.pad(q_sum, ((0, B_pad - B), (0, 0))).astype(jnp.bfloat16)
    m_p = jnp.pad(m_sum, ((0, B_pad - B), (0, M_pad - M), (0, 0))
                  ).astype(jnp.bfloat16)
    ct_in = ct_p if C_grid == C_pad else jnp.pad(
        ct_p, ((0, 0), (0, C_grid - C_pad)))

    kernel = functools.partial(memn2n_kernel, hops=hops, m_valid=M)
    grid = (B_pad // tb, C_grid // tc)

    cost = pl.CostEstimate(
        flops=int(B_pad * (hops * (4 * M_pad * E_pad + 2 * E_pad * E_pad)
                           + 2 * E_pad * C_grid)),
        transcendentals=int(B_pad * hops * (M_pad + 1)),
        bytes_accessed=int(q_p.size * 2 + m_p.size * 2 + ct_in.size * 2
                           + hwt_p.size * 2 + hb_p.size * 4
                           + B_pad * C_grid * 4),
    )

    out = pl.pallas_call(
        kernel,
        out_shape=jax.ShapeDtypeStruct((B_pad, C_grid), jnp.float32),
        grid_spec=pltpu.PrefetchScalarGridSpec(
            num_scalar_prefetch=0,
            grid=grid,
            in_specs=[
                pl.BlockSpec((tb, E_pad), lambda i, c: (i, 0)),        # q
                pl.BlockSpec((tb, M_pad, E_pad),
                             lambda i, c: (i, 0, 0)),                  # m
                pl.BlockSpec((E_pad, tc), lambda i, c: (0, c)),        # cand^T
                pl.BlockSpec((E_pad, E_pad), lambda i, c: (0, 0)),     # H^T
                pl.BlockSpec((1, E_pad), lambda i, c: (0, 0)),         # bias
            ],
            out_specs=pl.BlockSpec((tb, tc), lambda i, c: (i, c)),
            scratch_shapes=[pltpu.VMEM((tb, E_pad), jnp.float32)],     # u
        ),
        compiler_params=pltpu.CompilerParams(
            dimension_semantics=("parallel", "arbitrary")),
        cost_estimate=cost,
    )(q_p, m_p, ct_in, hwt_p, hb_p)

    return out[:B, :n_candidates]


def memn2n_reference(stories, query, candidates, embed_A, embed_W, H_w, H_b,
                     hops=3):
    """Pure-JAX f32 reference mirroring the PyTorch forward()."""
    u = jnp.sum(embed_A[query], axis=1)
    m_sum = jnp.sum(embed_A[stories], axis=2)
    for _ in range(hops):
        att = jnp.sum(m_sum * u[:, None, :], axis=2)
        att = jax.nn.softmax(att, axis=1)
        attn_stories = jnp.sum(att[:, :, None] * m_sum, axis=1)
        u = u @ H_w.T + H_b + attn_stories
    c_sum = jnp.sum(embed_W[candidates], axis=1)
    return u @ c_sum.T


if __name__ == "__main__":
    # Small, self-consistent shapes.
    batch_size = 4
    memory_size = 10      # number of story sentences per example
    sentence_size = 8
    embedding_size = 32
    vocab_size = 50
    candidates_size = 12
    hops = 3

    key = jax.random.PRNGKey(0)
    k_a, k_w, k_h, k_hb, k_s, k_q, k_c = jax.random.split(key, 7)

    # Deterministic parameter init (Embedding/Linear weights ~ N(0, 0.1),
    # embedding row 0 zeroed, as in the module __init__).
    embed_A = 0.1 * jax.random.normal(k_a, (vocab_size, embedding_size),
                                      dtype=jnp.float32)
    embed_A = embed_A.at[0].set(0.0)
    embed_W = 0.1 * jax.random.normal(k_w, (vocab_size, embedding_size),
                                      dtype=jnp.float32)
    embed_W = embed_W.at[0].set(0.0)
    H_w = 0.1 * jax.random.normal(k_h, (embedding_size, embedding_size),
                                  dtype=jnp.float32)
    H_b = 0.1 * jax.random.normal(k_hb, (embedding_size,), dtype=jnp.float32)

    # Integer token inputs.
    stories = jax.random.randint(
        k_s, (batch_size, memory_size, sentence_size), 0, vocab_size,
        dtype=jnp.int32)
    query = jax.random.randint(
        k_q, (batch_size, sentence_size), 0, vocab_size, dtype=jnp.int32)
    candidates_vec = jax.random.randint(
        k_c, (candidates_size, sentence_size), 0, vocab_size, dtype=jnp.int32)

    # Static per-model tensors prepared once (hoisted out of the forward).
    embed_A_pad, ct_p, hwt_p, hb_p, n_cand = prepare_params(
        embed_A, embed_W, candidates_vec, H_w, H_b)

    out = memn2n_forward(stories, query, embed_A_pad, ct_p, hwt_p, hb_p,
                         n_candidates=n_cand, hops=hops)
    out = jax.block_until_ready(out)

    ref = memn2n_reference(stories, query, candidates_vec,
                           embed_A, embed_W, H_w, H_b, hops=hops)
    ref = jax.block_until_ready(ref)

    assert out.shape == (batch_size, candidates_size)
    # bf16 kernel operands + approx reciprocal -> loosened tolerance vs f32 ref.
    assert jnp.allclose(out, ref, atol=5e-2, rtol=2e-2), (
        f"max abs diff {jnp.max(jnp.abs(out - ref))}")

    print("KERNEL_OK")
</pallas_src>

<mosaic_0001>
module attributes {stable_mosaic.version = 11 : i64} {
  func.func @memn2n_kernel(%arg0: i32, %arg1: i32, %arg2: memref<8x128xbf16, #tpu.memory_space<vmem>>, %arg3: memref<8x16x128xbf16, #tpu.memory_space<vmem>>, %arg4: memref<128x128xbf16, #tpu.memory_space<vmem>>, %arg5: memref<128x128xbf16, #tpu.memory_space<vmem>>, %arg6: memref<1x128xf32, #tpu.memory_space<vmem>>, %arg7: memref<8x128xf32, #tpu.memory_space<vmem>>, %arg8: memref<8x128xf32, #tpu.memory_space<vmem>>) attributes {dimension_semantics = [#tpu.dimension_semantics<parallel>, #tpu.dimension_semantics<arbitrary>], iteration_bounds = array<i64: 1, 1>, scalar_prefetch = 0 : i64, scratch_operands = 1 : i64, tpu.core_type = #tpu.core_type<tc>, window_params = [{transform_indices = @transform_0, window_bounds = array<i64: 8, 128>}, {transform_indices = @transform_1, window_bounds = array<i64: 8, 16, 128>}, {transform_indices = @transform_2, window_bounds = array<i64: 128, 128>}, {pipeline_mode = #tpu.pipeline_mode<synchronous>, transform_indices = @transform_3, window_bounds = array<i64: 128, 128>}, {pipeline_mode = #tpu.pipeline_mode<synchronous>, transform_indices = @transform_4, window_bounds = array<i64: 1, 128>}, {transform_indices = @transform_5, window_bounds = array<i64: 8, 128>}]} {
    %c0_i32 = arith.constant 0 : i32
    %0 = arith.cmpi eq, %arg1, %c0_i32 : i32
    %1 = arith.extui %0 : i1 to i32
    %c0_i32_0 = arith.constant 0 : i32
    %2 = arith.cmpi ne, %1, %c0_i32_0 : i32
    scf.if %2 {
      %c0_6 = arith.constant 0 : index
      %c0_7 = arith.constant 0 : index
      %8 = vector.load %arg2[%c0_6, %c0_7] : memref<8x128xbf16, #tpu.memory_space<vmem>>, vector<8x128xbf16>
      %9 = arith.extf %8 : vector<8x128xbf16> to vector<8x128xf32>
      %c0_8 = arith.constant 0 : index
      %c0_9 = arith.constant 0 : index
      %c0_10 = arith.constant 0 : index
      %10 = vector.load %arg3[%c0_8, %c0_9, %c0_10] : memref<8x16x128xbf16, #tpu.memory_space<vmem>>, vector<8x16x128xbf16>
      %11 = arith.extf %10 : vector<8x16x128xbf16> to vector<8x16x128xf32>
      %c0_11 = arith.constant 0 : index
      %c0_12 = arith.constant 0 : index
      %12 = vector.load %arg5[%c0_11, %c0_12] : memref<128x128xbf16, #tpu.memory_space<vmem>>, vector<128x128xbf16>
      %c0_13 = arith.constant 0 : index
      %c0_14 = arith.constant 0 : index
      %13 = vector.load %arg6[%c0_13, %c0_14] : memref<1x128xf32, #tpu.memory_space<vmem>>, vector<1x128xf32>
      %14 = vector.shape_cast %13 : vector<1x128xf32> to vector<1x128xf32>
      %15 = vector.broadcast %14 : vector<1x128xf32> to vector<8x128xf32>
      %16 = tpu.iota {dimensions = array<i32: 1>} : vector<8x16xi32>
      %c10_i32 = arith.constant 10 : i32
      %17 = vector.broadcast %c10_i32 : i32 to vector<8x16xi32>
      %18 = arith.cmpi slt, %16, %17 : vector<8x16xi32>
      %19 = vector.shape_cast %9 : vector<8x128xf32> to vector<8x1x128xf32>
      %20 = vector.broadcast %19 : vector<8x1x128xf32> to vector<8x16x128xf32>
      %21 = arith.mulf %11, %20 : vector<8x16x128xf32>
      %cst_15 = arith.constant dense<0.000000e+00> : vector<8x16xf32>
      %22 = vector.multi_reduction <add>, %21, %cst_15 [2] : vector<8x16x128xf32> to vector<8x16xf32>
      %cst_16 = arith.constant -1.000000e+30 : f32
      %23 = vector.broadcast %cst_16 : f32 to vector<8x16xf32>
      %24 = arith.select %18, %22, %23 : vector<8x16xi1>, vector<8x16xf32>
      %cst_17 = arith.constant dense<0xFF800000> : vector<8xf32>
      %25 = vector.multi_reduction <maximumf>, %24, %cst_17 [1] : vector<8x16xf32> to vector<8xf32>
      %26 = vector.shape_cast %25 : vector<8xf32> to vector<8x1xf32>
      %27 = vector.broadcast %26 : vector<8x1xf32> to vector<8x16xf32>
      %28 = arith.subf %24, %27 : vector<8x16xf32>
      %29 = math.exp %28 : vector<8x16xf32>
      %cst_18 = arith.constant dense<0.000000e+00> : vector<8xf32>
      %30 = vector.multi_reduction <add>, %29, %cst_18 [1] : vector<8x16xf32> to vector<8xf32>
      %31 = vector.shape_cast %30 : vector<8xf32> to vector<8x1xf32>
      %32 = tpu.reciprocal %31 {approx = true} : vector<8x1xf32> -> vector<8x1xf32>
      %33 = vector.broadcast %32 : vector<8x1xf32> to vector<8x16xf32>
      %34 = arith.mulf %29, %33 : vector<8x16xf32>
      %35 = vector.shape_cast %34 : vector<8x16xf32> to vector<8x16x1xf32>
      %36 = vector.broadcast %35 : vector<8x16x1xf32> to vector<8x16x128xf32>
      %37 = arith.mulf %36, %11 : vector<8x16x128xf32>
      %cst_19 = arith.constant dense<0.000000e+00> : vector<8x128xf32>
      %38 = vector.multi_reduction <add>, %37, %cst_19 [1] : vector<8x16x128xf32> to vector<8x128xf32>
      %39 = arith.truncf %9 : vector<8x128xf32> to vector<8x128xbf16>
      %cst_20 = arith.constant dense<0.000000e+00> : vector<8x128xf32>
      %40 = tpu.matmul %39, %12, %cst_20 {dimension_numbers = #tpu.dot_dimension_numbers<[1], [0], [0], [1], [0, 0, 1, 1], [], []>} : vector<8x128xbf16>, vector<128x128xbf16>, vector<8x128xf32> -> vector<8x128xf32>
      %41 = arith.addf %40, %15 : vector<8x128xf32>
      %42 = arith.addf %41, %38 : vector<8x128xf32>
      %43 = vector.shape_cast %42 : vector<8x128xf32> to vector<8x1x128xf32>
      %44 = vector.broadcast %43 : vector<8x1x128xf32> to vector<8x16x128xf32>
      %45 = arith.mulf %11, %44 : vector<8x16x128xf32>
      %cst_21 = arith.constant dense<0.000000e+00> : vector<8x16xf32>
      %46 = vector.multi_reduction <add>, %45, %cst_21 [2] : vector<8x16x128xf32> to vector<8x16xf32>
      %cst_22 = arith.constant -1.000000e+30 : f32
      %47 = vector.broadcast %cst_22 : f32 to vector<8x16xf32>
      %48 = arith.select %18, %46, %47 : vector<8x16xi1>, vector<8x16xf32>
      %cst_23 = arith.constant dense<0xFF800000> : vector<8xf32>
      %49 = vector.multi_reduction <maximumf>, %48, %cst_23 [1] : vector<8x16xf32> to vector<8xf32>
      %50 = vector.shape_cast %49 : vector<8xf32> to vector<8x1xf32>
      %51 = vector.broadcast %50 : vector<8x1xf32> to vector<8x16xf32>
      %52 = arith.subf %48, %51 : vector<8x16xf32>
      %53 = math.exp %52 : vector<8x16xf32>
      %cst_24 = arith.constant dense<0.000000e+00> : vector<8xf32>
      %54 = vector.multi_reduction <add>, %53, %cst_24 [1] : vector<8x16xf32> to vector<8xf32>
      %55 = vector.shape_cast %54 : vector<8xf32> to vector<8x1xf32>
      %56 = tpu.reciprocal %55 {approx = true} : vector<8x1xf32> -> vector<8x1xf32>
      %57 = vector.broadcast %56 : vector<8x1xf32> to vector<8x16xf32>
      %58 = arith.mulf %53, %57 : vector<8x16xf32>
      %59 = vector.shape_cast %58 : vector<8x16xf32> to vector<8x16x1xf32>
      %60 = vector.broadcast %59 : vector<8x16x1xf32> to vector<8x16x128xf32>
      %61 = arith.mulf %60, %11 : vector<8x16x128xf32>
      %cst_25 = arith.constant dense<0.000000e+00> : vector<8x128xf32>
      %62 = vector.multi_reduction <add>, %61, %cst_25 [1] : vector<8x16x128xf32> to vector<8x128xf32>
      %63 = arith.truncf %42 : vector<8x128xf32> to vector<8x128xbf16>
      %cst_26 = arith.constant dense<0.000000e+00> : vector<8x128xf32>
      %64 = tpu.matmul %63, %12, %cst_26 {dimension_numbers = #tpu.dot_dimension_numbers<[1], [0], [0], [1], [0, 0, 1, 1], [], []>} : vector<8x128xbf16>, vector<128x128xbf16>, vector<8x128xf32> -> vector<8x128xf32>
      %65 = arith.addf %64, %15 : vector<8x128xf32>
      %66 = arith.addf %65, %62 : vector<8x128xf32>
      %67 = vector.shape_cast %66 : vector<8x128xf32> to vector<8x1x128xf32>
      %68 = vector.broadcast %67 : vector<8x1x128xf32> to vector<8x16x128xf32>
      %69 = arith.mulf %11, %68 : vector<8x16x128xf32>
      %cst_27 = arith.constant dense<0.000000e+00> : vector<8x16xf32>
      %70 = vector.multi_reduction <add>, %69, %cst_27 [2] : vector<8x16x128xf32> to vector<8x16xf32>
      %cst_28 = arith.constant -1.000000e+30 : f32
      %71 = vector.broadcast %cst_28 : f32 to vector<8x16xf32>
      %72 = arith.select %18, %70, %71 : vector<8x16xi1>, vector<8x16xf32>
      %cst_29 = arith.constant dense<0xFF800000> : vector<8xf32>
      %73 = vector.multi_reduction <maximumf>, %72, %cst_29 [1] : vector<8x16xf32> to vector<8xf32>
      %74 = vector.shape_cast %73 : vector<8xf32> to vector<8x1xf32>
      %75 = vector.broadcast %74 : vector<8x1xf32> to vector<8x16xf32>
      %76 = arith.subf %72, %75 : vector<8x16xf32>
      %77 = math.exp %76 : vector<8x16xf32>
      %cst_30 = arith.constant dense<0.000000e+00> : vector<8xf32>
      %78 = vector.multi_reduction <add>, %77, %cst_30 [1] : vector<8x16xf32> to vector<8xf32>
      %79 = vector.shape_cast %78 : vector<8xf32> to vector<8x1xf32>
      %80 = tpu.reciprocal %79 {approx = true} : vector<8x1xf32> -> vector<8x1xf32>
      %81 = vector.broadcast %80 : vector<8x1xf32> to vector<8x16xf32>
      %82 = arith.mulf %77, %81 : vector<8x16xf32>
      %83 = vector.shape_cast %82 : vector<8x16xf32> to vector<8x16x1xf32>
      %84 = vector.broadcast %83 : vector<8x16x1xf32> to vector<8x16x128xf32>
      %85 = arith.mulf %84, %11 : vector<8x16x128xf32>
      %cst_31 = arith.constant dense<0.000000e+00> : vector<8x128xf32>
      %86 = vector.multi_reduction <add>, %85, %cst_31 [1] : vector<8x16x128xf32> to vector<8x128xf32>
      %87 = arith.truncf %66 : vector<8x128xf32> to vector<8x128xbf16>
      %cst_32 = arith.constant dense<0.000000e+00> : vector<8x128xf32>
      %88 = tpu.matmul %87, %12, %cst_32 {dimension_numbers = #tpu.dot_dimension_numbers<[1], [0], [0], [1], [0, 0, 1, 1], [], []>} : vector<8x128xbf16>, vector<128x128xbf16>, vector<8x128xf32> -> vector<8x128xf32>
      %89 = arith.addf %88, %15 : vector<8x128xf32>
      %90 = arith.addf %89, %86 : vector<8x128xf32>
      %c0_33 = arith.constant 0 : index
      %c0_34 = arith.constant 0 : index
      %91 = vector.load %arg8[%c0_33, %c0_34] : memref<8x128xf32, #tpu.memory_space<vmem>>, vector<8x128xf32>
      tpu.vector_store %arg8[%c0_33, %c0_34], %90 {strides = array<i32>} : memref<8x128xf32, #tpu.memory_space<vmem>>, vector<8x128xf32>,
    } else {
    }
    %c0 = arith.constant 0 : index
    %c0_1 = arith.constant 0 : index
    %3 = vector.load %arg8[%c0, %c0_1] : memref<8x128xf32, #tpu.memory_space<vmem>>, vector<8x128xf32>
    %4 = arith.truncf %3 : vector<8x128xf32> to vector<8x128xbf16>
    %c0_2 = arith.constant 0 : index
    %c0_3 = arith.constant 0 : index
    %5 = vector.load %arg4[%c0_2, %c0_3] : memref<128x128xbf16, #tpu.memory_space<vmem>>, vector<128x128xbf16>
    %cst = arith.constant dense<0.000000e+00> : vector<8x128xf32>
    %6 = tpu.matmul %4, %5, %cst {dimension_numbers = #tpu.dot_dimension_numbers<[1], [0], [0], [1], [0, 0, 1, 1], [], []>} : vector<8x128xbf16>, vector<128x128xbf16>, vector<8x128xf32> -> vector<8x128xf32>
    %c0_4 = arith.constant 0 : index
    %c0_5 = arith.constant 0 : index
    %7 = vector.load %arg7[%c0_4, %c0_5] : memref<8x128xf32, #tpu.memory_space<vmem>>, vector<8x128xf32>
    tpu.vector_store %arg7[%c0_4, %c0_5], %6 {strides = array<i32>} : memref<8x128xf32, #tpu.memory_space<vmem>>, vector<8x128xf32>,
    return
  }
  func.func @transform_0(%arg0: i32, %arg1: i32) -> (i32, i32) {
    %c0_i32 = arith.constant 0 : i32
    %c0_i32_0 = arith.constant 0 : i32
    return %arg0, %c0_i32 : i32, i32
  }
  func.func @transform_1(%arg0: i32, %arg1: i32) -> (i32, i32, i32) {
    %c0_i32 = arith.constant 0 : i32
    %c0_i32_0 = arith.constant 0 : i32
    %c0_i32_1 = arith.constant 0 : i32
    return %arg0, %c0_i32, %c0_i32_0 : i32, i32, i32
  }
  func.func @transform_2(%arg0: i32, %arg1: i32) -> (i32, i32) {
    %c0_i32 = arith.constant 0 : i32
    %c0_i32_0 = arith.constant 0 : i32
    return %c0_i32, %arg1 : i32, i32
  }
  func.func @transform_3(%arg0: i32, %arg1: i32) -> (i32, i32) {
    %c0_i32 = arith.constant 0 : i32
    %c0_i32_0 = arith.constant 0 : i32
    %c0_i32_1 = arith.constant 0 : i32
    return %c0_i32, %c0_i32_0 : i32, i32
  }
  func.func @transform_4(%arg0: i32, %arg1: i32) -> (i32, i32) {
    %c0_i32 = arith.constant 0 : i32
    %c0_i32_0 = arith.constant 0 : i32
    %c0_i32_1 = arith.constant 0 : i32
    return %c0_i32, %c0_i32_0 : i32, i32
  }
  func.func @transform_5(%arg0: i32, %arg1: i32) -> (i32, i32) {
    %c0_i32 = arith.constant 0 : i32
    return %arg0, %arg1 : i32, i32
  }
}

</mosaic_0001>

<bundles_post_ra>
// kernel: memn2n_forward.1
= control target key start
LH: loop header
LB: loop body
LE: loop exit
PB: predicated region body
PF: predicated region fallthrough
CT: control target
= control target key end

     0   :  { %v82_v0 = vlaneseq  ;;  %v1850_v2 = vmov 1966171168   ;;  %vm248_vm0 = vcmask 130112   ;;  %vm313_vm1 = vcmask 1041409   ;;  %s2390_s0 = inlined_call_operand.vmem [shape: bf16[8,128], index: 0, kind: input, shape index: {}]   ;;  %s2391_s1 = inlined_call_operand.vmem [shape: bf16[8,16,128], index: 1, kind: input, shape index: {}]   ;;  %s2392_s3 = inlined_call_operand.vmem [shape: bf16[128,128], index: 3, kind: input, shape index: {}]   ;;  %s2393_s4 = inlined_call_operand.vmem [shape: f32[1,128], index: 4, kind: input, shape index: {}]   ;;  %s2394_s2 = inlined_call_operand.vmem [shape: bf16[128,128], index: 2, kind: input, shape index: {}]   ;;  %s2395_s5 = inlined_call_operand.vmem [shape: f32[8,128], index: 5, kind: output, shape index: {}]  }
   0x1   :  { %v1886_v1 = vld [vmem:[%s2390_s0] sm:$0xf]  ;;  %v88_v3 = vunpack.c.l.s4 %v1850_v2  ;;  %v1695_v15 = vld [vmem:[%s2391_s1 + $0x8] sm:$0xff]   ;;  %v1696_v32 = vld [vmem:[%s2391_s1 + $0x10] sm:$0xff]   ;;  %vm315_vm2 = vcmask 1042434   ;;  %vm317_vm3 = vcmask 1043459  }
   0x2   :  { %v26_v4 = vunpack.c.l.bf16 %v1886_v1  ;;  %v1890_v5 = vshrl.u32 %v82_v0, 7  ;;  %v1664_v8 = vld [vmem:[%s2391_s1] sm:$0xff]   ;;  %v1919_v23 = vunpack.c.l.bf16 %v1695_v15  ;;  %v1929_v31 = vunpack.c.h.bf16 %v1695_v15  ;;  %v1697_v40 = vld [vmem:[%s2391_s1 + $0x18] sm:$0xff]   ;;  %v1699_v48 = vld [vmem:[%s2391_s1 + $0x28] sm:$0xff]  }
   0x3   :  { %v89_v6 = vunpack.c.0.s8 %v88_v3  ;;  %v1698_v10 = vld [vmem:[%s2391_s1 + $0x20] sm:$0xff]   ;;  %v1906_v14 = vunpack.c.l.bf16 %v1664_v8  ;;  %v1915_v20 = vunpack.c.h.bf16 %v1664_v8  ;;  %v1935_v35 = vunpack.c.h.bf16 %v1696_v32  ;;  %v1700_v55 = vld [vmem:[%s2391_s1 + $0x30] sm:$0xff]   ;;  %v1701_v61 = vld [vmem:[%s2391_s1 + $0x38] sm:$0xff]  }
   0x4   :  { %v86_v7 = vcombine.high %v26_v4, %v26_v4  ;;  %v1903_v12 = vsub.s32 0, %v1890_v5  ;;  %v1912_v17 = vunpack.c.h.bf16 %v1698_v10  ;;  %v1925_v28 = vunpack.c.l.bf16 %v1698_v10 }
   0x5   :  { %v1896_v9 = vsub.s32 %v89_v6, %v1890_v5  ;;  %v1939_v39 = vunpack.c.l.bf16 %v1696_v32  ;;  %v1944_v42 = vunpack.c.h.bf16 %v1697_v40  ;;  %v1950_v47 = vunpack.c.l.bf16 %v1697_v40 }
   0x6   :  { %v1955_v49 = vunpack.c.h.bf16 %v1699_v48  ;;  %v1960_v54 = vunpack.c.l.bf16 %v1699_v48  ;;  %v1965_v56 = vunpack.c.h.bf16 %v1700_v55  ;;  %v1970_v60 = vunpack.c.l.bf16 %v1700_v55 }
   0x7   :  { %v93_v11 = vrot.slane %v26_v4, %v1896_v9  ;;  %v100_v13 = vrot.slane %v86_v7, %v1896_v9  ;;  %v1975_v63 = vunpack.c.h.bf16 %v1701_v61  ;;  %v1980_v6 = vunpack.c.l.bf16 %v1701_v61 }
   0x8   :  { %vm319_vm4 = vcmask 1044484   ;;  %vm321_vm5 = vcmask 1045509   ;;  %vm323_vm6 = vcmask 1046534   ;;  %vm325_vm7 = vcmask 1047559  }
   0x9   :  { %v109_v16 = vrot.slane %v93_v11, %v1896_v9  ;;  %v116_v18 = vrot.slane %v100_v13, %v1896_v9  ;;  %v101_v19 = vcombine.high %v93_v11, %v93_v11  ;;  %v102_v36 = vcombine.high %v100_v13, %v100_v13 }
   0xa   :  { %vm329_vm9 = vcmask 130048   ;;  %vm1852_vm10 = vmmov 0  }
   0xb   :  { %v138_v21 = vrot.slane %v109_v16, %v1903_v12  ;;  %v154_v22 = vrot.slane %v116_v18, %v1903_v12  ;;  %v123_v24 = vrot.slane %v101_v19, %v1896_v9  ;;  %v131_v33 = vcombine.high %v109_v16, %v109_v16 }
   0xc   :  { %v130_v43 = vrot.slane %v102_v36, %v1896_v9  ;;  %v132_v50 = vcombine.high %v116_v18, %v116_v18  ;;  %v1985_v16 = vand.u32 127, %v82_v0 }
   0xd   :  { %v175_v25 = vmul.f32 %v1906_v14, %v138_v21  ;;  %v184_v26 = vmul.f32 %v1912_v17, %v154_v22  ;;  %v142_v27 = vrot.slane %v123_v24, %v1903_v12  ;;  %v176_v29 = vmul.f32 %v1915_v20, %v138_v21 }
   0xe   :  { %v183_v34 = vmul.f32 %v1925_v28, %v154_v22  ;;  %v146_v38 = vrot.slane %v131_v33, %v1903_v12  ;;  %v133_v41 = vcombine.high %v123_v24, %v123_v24  ;;  %v158_v53 = vrot.slane %v130_v43, %v1903_v12 }
   0xf   :  { %191 = vadd.xlane.f32.xlu0 %v175_v25  ;;  %209 = vadd.xlane.f32.xlu1 %v184_v26  ;;  %v177_v30 = vmul.f32 %v1919_v23, %v142_v27  ;;  %v178_v37 = vmul.f32 %v1929_v31, %v142_v27  ;;  %v162_v57 = vrot.slane %v132_v50, %v1903_v12  ;;  %v243_v21 = vadd.s32 4294967288, %v1985_v16 }
  0x10   :  { %v180_v44 = vmul.f32 %v1935_v35, %v146_v38  ;;  %v179_v45 = vmul.f32 %v1939_v39, %v146_v38  ;;  %v150_v46 = vrot.slane %v133_v41, %v1903_v12  ;;  %v186_v58 = vmul.f32 %v1955_v49, %v158_v53 }
  0x11   :  { %v185_v59 = vmul.f32 %v1960_v54, %v158_v53  ;;  %v134_v62 = vcombine.high %v130_v43, %v130_v43  ;;  %v188_v2 = vmul.f32 %v1965_v56, %v162_v57  ;;  %v187_v3 = vmul.f32 %v1970_v60, %v162_v57 }
  0x12   :  { %v182_v51 = vmul.f32 %v1944_v42, %v150_v46  ;;  %v181_v52 = vmul.f32 %v1950_v47, %v150_v46  ;;  %v1989_v25 = vsub.s32 %v243_v21, %v1890_v5  ;;  %v1993_v26 = vsub.s32 %v1985_v16, %v1890_v5 }
  0x13   :  { %193 = vadd.xlane.f32.xlu0 %v176_v29  ;;  %195 = vadd.xlane.f32.xlu1 %v177_v30  ;;  %v166_v4 = vrot.slane %v134_v62, %v1903_v12  ;;  %vm84_vm8 = vcmp.lt.s32.totalorder %v1985_v16, 10 }
  0x15   :  { %v190_v7 = vmul.f32 %v1975_v63, %v166_v4  ;;  %v189_v8 = vmul.f32 %v1980_v6, %v166_v4 }
  0x17   :  { %197 = vadd.xlane.f32.xlu1 %v178_v37  ;;  %207 = vadd.xlane.f32.xlu0 %v183_v34 }
  0x1b   :  { %201 = vadd.xlane.f32.xlu1 %v180_v44  ;;  %199 = vadd.xlane.f32.xlu0 %v179_v45 }
  0x1f   :  { %205 = vadd.xlane.f32.xlu1 %v182_v51  ;;  %203 = vadd.xlane.f32.xlu0 %v181_v52 }
  0x23   :  { %213 = vadd.xlane.f32.xlu1 %v186_v58  ;;  %211 = vadd.xlane.f32.xlu0 %v185_v59 }
  0x27   :  { %217 = vadd.xlane.f32.xlu1 %v188_v2  ;;  %215 = vadd.xlane.f32.xlu0 %v187_v3 }
  0x2b   :  { %221 = vadd.xlane.f32.xlu1 %v190_v7  ;;  %219 = vadd.xlane.f32.xlu0 %v189_v8 }
  0x98   :  { %v192_v10 = vpop.xlane.xlu0 %191  ;;  %v210_v11 = vpop.xlane.xlu1 %209 }
  0x99   :  { %v242_v41 = vrot.slane %v192_v10, %v1993_v26  ;;  %v284_v61 = vrot.slane %v210_v11, %v1989_v25 }
  0x9c   :  { %v194_v13 = vpop.xlane.xlu0 %193  ;;  %v196_v15 = vpop.xlane.xlu1 %195 }
  0x9d   :  { %v247_v33 = vrot.slane %v194_v13, %v1989_v25  ;;  %v253_v34 = vrot.slane %v196_v15, %v1993_v26 }
  0x9f   :  { %v249_v45 = vsel %vm248_vm0, %v247_v33, %v242_v41  ;;  %v1825_v33 = vld [vmem:[%s2392_s3 + $0x18] sm:$0xff]  }
  0xa0   :  { %v198_v18 = vpop.xlane.xlu1 %197  ;;  %v208_v19 = vpop.xlane.xlu0 %207 }
  0xa1   :  { %v257_v30 = vrot.slane %v198_v18, %v1989_v25  ;;  %v280_v52 = vrot.slane %v208_v19, %v1993_v26 }
  0xa3   :  { %v258_v43 = vsel %vm248_vm0, %v257_v30, %v253_v34  ;;  %v285_v3 = vsel %vm248_vm0, %v284_v61, %v280_v52  ;;  %v1822_v30 = vld [vmem:[%s2392_s3 + $0x30] sm:$0xff]   ;;  %v2109_v61 = vsub.s32 5, %v1890_v5 }
  0xa4   :  { %v202_v22 = vpop.xlane.xlu1 %201  ;;  %v200_v24 = vpop.xlane.xlu0 %199  ;;  %v314_v51 = vsel %vm313_vm1, %v258_v43, %v249_v45  ;;  %v1826_v34 = vld [vmem:[%s2392_s3 + $0x10] sm:$0xff]  }
  0xa5   :  { %v266_v0 = vrot.slane %v202_v22, %v1989_v25  ;;  %v262_v32 = vrot.slane %v200_v24, %v1993_v26 }
  0xa7   :  { %v267_v44 = vsel %vm248_vm0, %v266_v0, %v262_v32  ;;  %v1823_v0 = vld [vmem:[%s2392_s3 + $0x28] sm:$0xff]   ;;  %v1824_v32 = vld [vmem:[%s2392_s3 + $0x20] sm:$0xff]  }
  0xa8   :  { %v206_v27 = vpop.xlane.xlu1 %205  ;;  %v204_v29 = vpop.xlane.xlu0 %203  ;;  %v316_v57 = vsel %vm315_vm2, %v267_v44, %v314_v51  ;;  %v2096_v51 = vsub.s32 2, %v1890_v5 }
  0xa9   :  { %v275_v36 = vrot.slane %v206_v27, %v1989_v25  ;;  %v271_v37 = vrot.slane %v204_v29, %v1993_v26  ;;  %v1851_v27 = vmov 0.0   ;;  %v1821_v29 = vld [vmem:[%s2392_s3 + $0x38] sm:$0xff]  }
  0xaa   :  { %1738 = vmatprep.subr.bf16.mxu0 %v1851_v27  ;;  %1754 = vmatprep.mubr.msk.bf16.mxu0 %vm1852_vm10, %v1851_v27 }
  0xab   :  { %v276_v46 = vsel %vm248_vm0, %v275_v36, %v271_v37  ;;  %1758 = vmatprep.subr.bf16.mxu1 %v1851_v27  ;;  %1774 = vmatprep.mubr.msk.bf16.mxu1 %vm1852_vm10, %v1851_v27  ;;  %v1827_v36 = vld [vmem:[%s2392_s3 + $0x8] sm:$0xff]   ;;  %v1828_v37 = vld [vmem:[%s2392_s3] sm:$0xff]  }
  0xac   :  { %v214_v38 = vpop.xlane.xlu1 %213  ;;  %v212_v40 = vpop.xlane.xlu0 %211  ;;  %v318_v62 = vsel %vm317_vm3, %v276_v46, %v316_v57  ;;  %1739 = vmatpush3.bf16.msra.mxu0 %v1821_v29  ;;  %1759 = vmatpush3.bf16.msra.mxu1 %v1821_v29 }
  0xad   :  { %v293_v48 = vrot.slane %v214_v38, %v1989_v25  ;;  %v289_v50 = vrot.slane %v212_v40, %v1993_v26  ;;  %v320_v15 = vsel %vm319_vm4, %v285_v3, %v318_v62  ;;  %1740 = vmatprep.subr.bf16.mxu0 %v1851_v27  ;;  %1760 = vmatprep.subr.bf16.mxu1 %v1851_v27 }
  0xaf   :  { %v294_v2 = vsel %vm248_vm0, %v293_v48, %v289_v50  ;;  %v2093_v50 = vsub.s32 1, %v1890_v5 }
  0xb0   :  { %v218_v53 = vpop.xlane.xlu1 %217  ;;  %v216_v55 = vpop.xlane.xlu0 %215  ;;  %v322_v11 = vsel %vm321_vm5, %v294_v2, %v320_v15  ;;  %1741 = vmatpush3.bf16.msra.mxu0 %v1822_v30  ;;  %1761 = vmatpush3.bf16.msra.mxu1 %v1822_v30  ;;  %v2113_v2 = vsub.s32 6, %v1890_v5 }
  0xb1   :  { %v302_v58 = vrot.slane %v218_v53, %v1989_v25  ;;  %v298_v59 = vrot.slane %v216_v55, %v1993_v26  ;;  %1742 = vmatprep.subr.bf16.mxu0 %v1851_v27  ;;  %1762 = vmatprep.subr.bf16.mxu1 %v1851_v27  ;;  %v2101_v55 = vsub.s32 3, %v1890_v5 }
  0xb3   :  { %v303_v4 = vsel %vm248_vm0, %v302_v58, %v298_v59  ;;  %v2105_v58 = vsub.s32 4, %v1890_v5 }
  0xb4   :  { %v222_v7 = vpop.xlane.xlu1 %221  ;;  %v220_v8 = vpop.xlane.xlu0 %219  ;;  %v324_v19 = vsel %vm323_vm6, %v303_v4, %v322_v11  ;;  %1743 = vmatpush3.bf16.msra.mxu0 %v1823_v0  ;;  %1763 = vmatpush3.bf16.msra.mxu1 %v1823_v0  ;;  %v2117_v4 = vsub.s32 7, %v1890_v5 }
  0xb5   :  { %v311_v10 = vrot.slane %v222_v7, %v1989_v25  ;;  %v307_v13 = vrot.slane %v220_v8, %v1993_v26  ;;  %1744 = vmatprep.subr.bf16.mxu0 %v1851_v27  ;;  %1764 = vmatprep.subr.bf16.mxu1 %v1851_v27 }
  0xb7   :  { %v312_v18 = vsel %vm248_vm0, %v311_v10, %v307_v13 }
  0xb8   :  { %v326_v21 = vsel %vm325_vm7, %v312_v18, %v324_v19  ;;  %1745 = vmatpush3.bf16.msra.mxu0 %v1824_v32  ;;  %1765 = vmatpush3.bf16.msra.mxu1 %v1824_v32 }
  0xb9   :  { %v2029_v22 = vsel %vm84_vm8, %v326_v21, -1e+30  ;;  %1746 = vmatprep.subr.bf16.mxu0 %v1851_v27  ;;  %1766 = vmatprep.subr.bf16.mxu1 %v1851_v27 }
  0xba   :  { %v330_v24 = vsel %vm329_vm9, %v2029_v22, -inf }
  0xbb   :  { %331 = vmax.xlane.f32.xlu0 %v330_v24 }
  0xbc   :  { %1747 = vmatpush3.bf16.msra.mxu0 %v1825_v33  ;;  %1767 = vmatpush3.bf16.msra.mxu1 %v1825_v33 }
  0xbd   :  { %1748 = vmatprep.subr.bf16.mxu0 %v1851_v27  ;;  %1768 = vmatprep.subr.bf16.mxu1 %v1851_v27 }
  0xc0   :  { %1749 = vmatpush3.bf16.msra.mxu0 %v1826_v34  ;;  %1769 = vmatpush3.bf16.msra.mxu1 %v1826_v34 }
  0xc1   :  { %1750 = vmatprep.subr.bf16.mxu0 %v1851_v27  ;;  %1770 = vmatprep.subr.bf16.mxu1 %v1851_v27 }
  0xc4   :  { %1751 = vmatpush3.bf16.msra.mxu0 %v1827_v36  ;;  %1771 = vmatpush3.bf16.msra.mxu1 %v1827_v36 }
  0xc5   :  { %1752 = vmatprep.subr.bf16.mxu0 %v1851_v27  ;;  %1772 = vmatprep.subr.bf16.mxu1 %v1851_v27 }
  0xc8   :  { %1753 = vmatpush3.bf16.msra.mxu0 %v1828_v37  ;;  %1773 = vmatpush3.bf16.msra.mxu1 %v1828_v37 }
  0xc9   :  { %1778 = vmatprep.subr.bf16.mxu0 %v1851_v27  ;;  %1798 = vmatprep.subr.bf16.mxu1 %v1851_v27 }
  0xcb   :  { %1755 = vmatmul.mubr.bf16.vlgmr.msra.gmra.mxu0 %v1886_v1 }
  0xcc   :  { %1779 = vmatpush3.bf16.msra.mxu0 %v1821_v29  ;;  %1794 = vmatprep.mubr.msk.bf16.mxu0 %vm1852_vm10, %v1851_v27 }
  0xcd   :  { %1780 = vmatprep.subr.bf16.mxu0 %v1851_v27 }
  0xd0   :  { %1781 = vmatpush3.bf16.msra.mxu0 %v1822_v30 }
  0xd1   :  { %1782 = vmatprep.subr.bf16.mxu0 %v1851_v27 }
  0xd4   :  { %1783 = vmatpush3.bf16.msra.mxu0 %v1823_v0 }
  0xd5   :  { %1784 = vmatprep.subr.bf16.mxu0 %v1851_v27 }
  0xd8   :  { %1785 = vmatpush3.bf16.msra.mxu0 %v1824_v32 }
  0xd9   :  { %1786 = vmatprep.subr.bf16.mxu0 %v1851_v27 }
  0xdc   :  { %1787 = vmatpush3.bf16.msra.mxu0 %v1825_v33 }
  0xdd   :  { %1788 = vmatprep.subr.bf16.mxu0 %v1851_v27 }
  0xe0   :  { %1789 = vmatpush3.bf16.msra.mxu0 %v1826_v34 }
  0xe1   :  { %1790 = vmatprep.subr.bf16.mxu0 %v1851_v27 }
  0xe4   :  { %1791 = vmatpush3.bf16.msra.mxu0 %v1827_v36 }
  0xe5   :  { %1792 = vmatprep.subr.bf16.mxu0 %v1851_v27 }
  0xe8   :  { %1793 = vmatpush3.bf16.msra.mxu0 %v1828_v37 }
 0x144   :  { %v332_v1 = vpop.xlane.xlu0 %331 }
 0x145   :  { %v333_v38 = vsub.f32 %v2029_v22, %v332_v1 }
 0x147   :  { %v334_v40 = vmul.f32 1.442695, %v333_v38 }
 0x149   :  { %1837 = vpow2.f32 %v334_v40 }
 0x156   :  { %v1838_v41 = vpop.eup %1837 }
 0x157   :  { %v336_v43 = vsel %vm329_vm9, %v1838_v41, 0.0 }
 0x158   :  { %337 = vadd.xlane.f32.xlu1 %v336_v43 }
 0x18b   :  { %v2120_v8 = vpop.f32.mrf.mxu0 }
 0x18d   :  { %v1756_v10 = vpop.f32.mrf.mxu0 }
 0x18f   :  { %v586_v13 = vpop.f32.mrf.mxu0 }
 0x191   :  { %v1757_v15 = vpop.f32.mrf.mxu0 }
 0x1e1   :  { %v338_v44 = vpop.xlane.xlu1 %337 }
 0x1e2   :  { %1839 = vrcp.f32 %v338_v44 }
 0x1ef   :  { %v1840_v45 = vpop.eup %1839 }
 0x1f0   :  { %v340_v46 = vmul.f32 %v1840_v45, %v1838_v41 }
 0x1f2   :  { %v344_v48 = vrot.slane %v340_v46, %v1903_v12  ;;  %v355_v52 = vrot.slane %v340_v46, %v2093_v50  ;;  %v366_v53 = vrot.slane %v340_v46, %v2096_v51  ;;  %v377_v57 = vrot.slane %v340_v46, %v2101_v55 }
 0x1f3   :  { %v388_v59 = vrot.slane %v340_v46, %v2105_v58  ;;  %v399_v62 = vrot.slane %v340_v46, %v2109_v61  ;;  %v410_v3 = vrot.slane %v340_v46, %v2113_v2  ;;  %v421_v7 = vrot.slane %v340_v46, %v2117_v4 }
 0x1f4   :  { %350 = vbcast.lane.b32.xlu1 %v344_v48, 264  ;;  %346 = vbcast.lane.b32.xlu0 %v344_v48, 256 }
 0x1f8   :  { %357 = vbcast.lane.b32.xlu1 %v355_v52, 256  ;;  %368 = vbcast.lane.b32.xlu0 %v366_v53, 256 }
 0x1fc   :  { %361 = vbcast.lane.b32.xlu1 %v355_v52, 264  ;;  %379 = vbcast.lane.b32.xlu0 %v377_v57, 256 }
 0x200   :  { %372 = vbcast.lane.b32.xlu1 %v366_v53, 264  ;;  %390 = vbcast.lane.b32.xlu0 %v388_v59, 256 }
 0x204   :  { %383 = vbcast.lane.b32.xlu1 %v377_v57, 264  ;;  %401 = vbcast.lane.b32.xlu0 %v399_v62, 256 }
 0x208   :  { %394 = vbcast.lane.b32.xlu1 %v388_v59, 264  ;;  %412 = vbcast.lane.b32.xlu0 %v410_v3, 256 }
 0x20c   :  { %405 = vbcast.lane.b32.xlu1 %v399_v62, 264  ;;  %423 = vbcast.lane.b32.xlu0 %v421_v7, 256 }
 0x210   :  { %416 = vbcast.lane.b32.xlu1 %v410_v3, 264 }
 0x214   :  { %427 = vbcast.lane.b32.xlu1 %v421_v7, 264 }
 0x266   :  { %v351_v11 = vpop.permute.xlu1 %350  ;;  %v347_v18 = vpop.permute.xlu0 %346 }
 0x267   :  { %v430_v29 = vmul.f32 %v1915_v20, %v351_v11  ;;  %v429_v30 = vmul.f32 %v1906_v14, %v347_v18 }
 0x269   :  { %v445_v1 = vadd.f32 %v430_v29, %v429_v30 }
 0x26a   :  { %v358_v19 = vpop.permute.xlu1 %357  ;;  %v369_v21 = vpop.permute.xlu0 %368 }
 0x26b   :  { %v431_v33 = vmul.f32 %v1919_v23, %v358_v19  ;;  %v433_v36 = vmul.f32 %v1939_v39, %v369_v21  ;;  %v446_v48 = vrot.slane %v445_v1, 4 }
 0x26d   :  { %v447_v10 = vadd.f32 %v446_v48, %v445_v1 }
 0x26e   :  { %v362_v22 = vpop.permute.xlu1 %361  ;;  %v380_v5 = vpop.permute.xlu0 %379 }
 0x26f   :  { %v432_v24 = vmul.f32 %v1929_v31, %v362_v22  ;;  %v435_v41 = vmul.f32 %v1950_v47, %v380_v5  ;;  %v448_v29 = vrot.slane %v447_v10, 2 }
 0x271   :  { %v452_v37 = vadd.f32 %v432_v24, %v431_v33 }
 0x272   :  { %v373_v0 = vpop.permute.xlu1 %372  ;;  %v391_v32 = vpop.permute.xlu0 %390 }
 0x273   :  { %v434_v34 = vmul.f32 %v1935_v35, %v373_v0  ;;  %v453_v45 = vrot.slane %v452_v37, 4  ;;  %v437_v57 = vmul.f32 %v1925_v28, %v391_v32 }
 0x275   :  { %v459_v38 = vadd.f32 %v434_v34, %v433_v36  ;;  %v454_v3 = vadd.f32 %v453_v45, %v452_v37 }
 0x276   :  { %v384_v40 = vpop.permute.xlu1 %383  ;;  %v402_v44 = vpop.permute.xlu0 %401 }
 0x277   :  { %v436_v43 = vmul.f32 %v1944_v42, %v384_v40  ;;  %v460_v52 = vrot.slane %v459_v38, 4  ;;  %v439_v21 = vmul.f32 %v1960_v54, %v402_v44  ;;  %v455_v5 = vrot.slane %v454_v3, 2 }
 0x279   :  { %v466_v46 = vadd.f32 %v436_v43, %v435_v41  ;;  %v461_v13 = vadd.f32 %v460_v52, %v459_v38  ;;  %v456_v40 = vadd.f32 %v455_v5, %v454_v3  ;;  %v449_v43 = vadd.f32 %v448_v29, %v447_v10 }
 0x27a   :  { %v395_v53 = vpop.permute.xlu1 %394  ;;  %v413_v15 = vpop.permute.xlu0 %412 }
 0x27b   :  { %v467_v59 = vrot.slane %v466_v46, 4  ;;  %v438_v62 = vmul.f32 %v1912_v17, %v395_v53  ;;  %v462_v30 = vrot.slane %v461_v13, 2  ;;  %v441_v34 = vmul.f32 %v1970_v60, %v413_v15 }
 0x27d   :  { %v473_v7 = vadd.f32 %v438_v62, %v437_v57  ;;  %v468_v18 = vadd.f32 %v467_v59, %v466_v46  ;;  %v463_v44 = vadd.f32 %v462_v30, %v461_v13 }
 0x27e   :  { %v406_v11 = vpop.permute.xlu1 %405  ;;  %v424_v38 = vpop.permute.xlu0 %423 }
 0x27f   :  { %v474_v19 = vrot.slane %v473_v7, 4  ;;  %v440_v22 = vmul.f32 %v1955_v49, %v406_v11  ;;  %v469_v33 = vrot.slane %v468_v18, 2  ;;  %v443_v52 = vmul.f32 %v1980_v6, %v424_v38 }
 0x281   :  { %v475_v24 = vadd.f32 %v474_v19, %v473_v7  ;;  %v480_v0 = vadd.f32 %v440_v22, %v439_v21  ;;  %v470_v48 = vadd.f32 %v469_v33, %v468_v18  ;;  %v457_v7 = vrot.slane %v456_v40, 1 }
 0x282   :  { %v417_v32 = vpop.permute.xlu1 %416  ;;  %v464_v19 = vrot.slane %v463_v44, 1  ;;  %v450_v22 = vrot.slane %v449_v43, 1 }
 0x283   :  { %v442_v36 = vmul.f32 %v1965_v56, %v417_v32  ;;  %v476_v37 = vrot.slane %v475_v24, 2  ;;  %v481_v1 = vrot.slane %v480_v0, 4  ;;  %v471_v3 = vrot.slane %v470_v48, 1 }
 0x284   :  { %v458_v29 = vadd.f32 %v457_v7, %v456_v40  ;;  %v465_v32 = vadd.f32 %v464_v19, %v463_v44  ;;  %v451_v33 = vadd.f32 %v450_v22, %v449_v43 }
 0x285   :  { %v487_v41 = vadd.f32 %v442_v36, %v441_v34  ;;  %v482_v45 = vadd.f32 %v481_v1, %v480_v0  ;;  %v477_v59 = vadd.f32 %v476_v37, %v475_v24  ;;  %v472_v34 = vadd.f32 %v471_v3, %v470_v48 }
 0x286   :  { %v428_v46 = vpop.permute.xlu1 %427  ;;  %v597_v1 = vsel %vm313_vm1, %v458_v29, %v451_v33 }
 0x287   :  { %v488_v53 = vrot.slane %v487_v41, 4  ;;  %v444_v57 = vmul.f32 %v1975_v63, %v428_v46  ;;  %v483_v62 = vrot.slane %v482_v45, 2  ;;  %v478_v13 = vrot.slane %v477_v59, 1 }
 0x288   :  { %v598_v40 = vsel %vm315_vm2, %v465_v32, %v597_v1 }
 0x289   :  { %v489_v15 = vadd.f32 %v488_v53, %v487_v41  ;;  %v494_v11 = vadd.f32 %v444_v57, %v443_v52  ;;  %v484_v21 = vadd.f32 %v483_v62, %v482_v45  ;;  %v479_v37 = vadd.f32 %v478_v13, %v477_v59  ;;  %v2142_v45 = vld [vmem:[%s2393_s4] ss:$0 sm:$0xff] }
 0x28a   :  { %v599_v44 = vsel %vm317_vm3, %v472_v34, %v598_v40  ;;  %v584_v43 = vadd.f32 %v2142_v45, %v2120_v8 }
 0x28b   :  { %v490_v5 = vrot.slane %v489_v15, 2  ;;  %v495_v10 = vrot.slane %v494_v11, 4  ;;  %v485_v30 = vrot.slane %v484_v21, 1  ;;  %v600_v48 = vsel %vm319_vm4, %v479_v37, %v599_v44 }
 0x28d   :  { %v491_v18 = vadd.f32 %v490_v5, %v489_v15  ;;  %v496_v0 = vadd.f32 %v495_v10, %v494_v11  ;;  %v486_v38 = vadd.f32 %v485_v30, %v484_v21 }
 0x28f   :  { %v492_v36 = vrot.slane %v491_v18, 1  ;;  %v497_v24 = vrot.slane %v496_v0, 2  ;;  %v601_v57 = vsel %vm321_vm5, %v486_v38, %v600_v48 }
 0x291   :  { %v498_v41 = vadd.f32 %v497_v24, %v496_v0  ;;  %v493_v46 = vadd.f32 %v492_v36, %v491_v18 }
 0x293   :  { %v499_v52 = vrot.slane %v498_v41, 1  ;;  %v602_v59 = vsel %vm323_vm6, %v493_v46, %v601_v57 }
 0x295   :  { %v500_v53 = vadd.f32 %v499_v52, %v498_v41 }
 0x297   :  { %v603_v62 = vsel %vm325_vm7, %v500_v53, %v602_v59 }
 0x298   :  { %v605_v7 = vadd.f32 %v603_v62, %v584_v43 }
 0x29a   :  { %v607_v15 = vcombine.high %v605_v7, %v605_v7  ;;  %v614_v11 = vrot.slane %v605_v7, %v1896_v9  ;;  %v1012_v19 = vpack.c.bf16 %v605_v7, %v605_v7 }
 0x29c   :  { %1775 = vmatmul.mubr.bf16.vlgmr.msra.gmra.mxu1 %v1012_v19  ;;  %v630_v21 = vrot.slane %v614_v11, %v1896_v9  ;;  %v622_v22 = vcombine.high %v614_v11, %v614_v11  ;;  %v621_v8 = vrot.slane %v607_v15, %v1896_v9 }
 0x29d   :  { %1814 = vmatprep.mubr.msk.bf16.mxu1 %vm1852_vm10, %v1851_v27 }
 0x29e   :  { %v659_v3 = vrot.slane %v630_v21, %v1903_v12  ;;  %v652_v5 = vcombine.high %v630_v21, %v630_v21  ;;  %v644_v10 = vrot.slane %v622_v22, %v1896_v9  ;;  %v637_v13 = vrot.slane %v621_v8, %v1896_v9 }
 0x29f   :  { %v623_v32 = vcombine.high %v621_v8, %v621_v8 }
 0x2a0   :  { %v697_v29 = vmul.f32 %v1915_v20, %v659_v3  ;;  %v696_v30 = vmul.f32 %v1906_v14, %v659_v3  ;;  %v667_v18 = vrot.slane %v652_v5, %v1903_v12  ;;  %v663_v0 = vrot.slane %v644_v10, %v1903_v12 }
 0x2a1   :  { %v675_v36 = vrot.slane %v637_v13, %v1903_v12  ;;  %v654_v24 = vcombine.high %v644_v10, %v644_v10  ;;  %v651_v41 = vrot.slane %v623_v32, %v1896_v9  ;;  %v653_v44 = vcombine.high %v637_v13, %v637_v13 }
 0x2a2   :  { %714 = vadd.xlane.f32.xlu1 %v697_v29  ;;  %712 = vadd.xlane.f32.xlu0 %v696_v30  ;;  %v701_v33 = vmul.f32 %v1935_v35, %v667_v18  ;;  %v698_v34 = vmul.f32 %v1919_v23, %v663_v0  ;;  %v699_v37 = vmul.f32 %v1929_v31, %v663_v0 }
 0x2a3   :  { %v705_v1 = vmul.f32 %v1912_v17, %v675_v36  ;;  %v671_v38 = vrot.slane %v654_v24, %v1903_v12  ;;  %v700_v40 = vmul.f32 %v1939_v39, %v667_v18  ;;  %v679_v52 = vrot.slane %v651_v41, %v1903_v12 }
 0x2a4   :  { %v704_v43 = vmul.f32 %v1925_v28, %v675_v36  ;;  %v683_v53 = vrot.slane %v653_v44, %v1903_v12  ;;  %v655_v57 = vcombine.high %v651_v41, %v651_v41 }
 0x2a5   :  { %v703_v46 = vmul.f32 %v1944_v42, %v671_v38  ;;  %v707_v48 = vmul.f32 %v1955_v49, %v679_v52  ;;  %v702_v59 = vmul.f32 %v1950_v47, %v671_v38  ;;  %v706_v15 = vmul.f32 %v1960_v54, %v679_v52 }
 0x2a6   :  { %722 = vadd.xlane.f32.xlu1 %v701_v33  ;;  %716 = vadd.xlane.f32.xlu0 %v698_v34  ;;  %v709_v62 = vmul.f32 %v1965_v56, %v683_v53  ;;  %v687_v7 = vrot.slane %v655_v57, %v1903_v12  ;;  %v708_v19 = vmul.f32 %v1970_v60, %v683_v53 }
 0x2a8   :  { %v711_v11 = vmul.f32 %v1975_v63, %v687_v7  ;;  %v710_v21 = vmul.f32 %v1980_v6, %v687_v7 }
 0x2aa   :  { %718 = vadd.xlane.f32.xlu0 %v699_v37  ;;  %730 = vadd.xlane.f32.xlu1 %v705_v1 }
 0x2ae   :  { %720 = vadd.xlane.f32.xlu0 %v700_v40  ;;  %726 = vadd.xlane.f32.xlu1 %v703_v46 }
 0x2b2   :  { %728 = vadd.xlane.f32.xlu0 %v704_v43  ;;  %734 = vadd.xlane.f32.xlu1 %v707_v48 }
 0x2b6   :  { %724 = vadd.xlane.f32.xlu0 %v702_v59  ;;  %738 = vadd.xlane.f32.xlu1 %v709_v62 }
 0x2ba   :  { %732 = vadd.xlane.f32.xlu0 %v706_v15  ;;  %742 = vadd.xlane.f32.xlu1 %v711_v11 }
 0x2be   :  { %736 = vadd.xlane.f32.xlu0 %v708_v19 }
 0x2c2   :  { %740 = vadd.xlane.f32.xlu0 %v710_v21 }
 0x32b   :  { %v715_v22 = vpop.xlane.xlu1 %714  ;;  %v713_v8 = vpop.xlane.xlu0 %712 }
 0x32c   :  { %v767_v36 = vrot.slane %v715_v22, %v1989_v25  ;;  %v763_v24 = vrot.slane %v713_v8, %v1993_v26 }
 0x32e   :  { %v768_v43 = vsel %vm248_vm0, %v767_v36, %v763_v24 }
 0x32f   :  { %v723_v3 = vpop.xlane.xlu1 %722  ;;  %v717_v5 = vpop.xlane.xlu0 %716 }
 0x330   :  { %v772_v37 = vrot.slane %v717_v5, %v1993_v26  ;;  %v785_v38 = vrot.slane %v723_v3, %v1989_v25 }
 0x333   :  { %v719_v10 = vpop.xlane.xlu0 %718  ;;  %v731_v13 = vpop.xlane.xlu1 %730 }
 0x334   :  { %v776_v33 = vrot.slane %v719_v10, %v1989_v25  ;;  %v803_v19 = vrot.slane %v731_v13, %v1989_v25 }
 0x336   :  { %v777_v46 = vsel %vm248_vm0, %v776_v33, %v772_v37 }
 0x337   :  { %v721_v29 = vpop.xlane.xlu0 %720  ;;  %v727_v30 = vpop.xlane.xlu1 %726  ;;  %v832_v57 = vsel %vm313_vm1, %v777_v46, %v768_v43 }
 0x338   :  { %v781_v34 = vrot.slane %v721_v29, %v1993_v26  ;;  %v794_v52 = vrot.slane %v727_v30, %v1989_v25 }
 0x33a   :  { %v786_v44 = vsel %vm248_vm0, %v785_v38, %v781_v34 }
 0x33b   :  { %v729_v18 = vpop.xlane.xlu0 %728  ;;  %v735_v0 = vpop.xlane.xlu1 %734  ;;  %v833_v7 = vsel %vm315_vm2, %v786_v44, %v832_v57 }
 0x33c   :  { %v799_v59 = vrot.slane %v729_v18, %v1993_v26  ;;  %v812_v15 = vrot.slane %v735_v0, %v1989_v25 }
 0x33e   :  { %v804_v5 = vsel %vm248_vm0, %v803_v19, %v799_v59 }
 0x33f   :  { %v725_v32 = vpop.xlane.xlu0 %724  ;;  %v739_v41 = vpop.xlane.xlu1 %738 }
 0x340   :  { %v790_v1 = vrot.slane %v725_v32, %v1993_v26  ;;  %v821_v22 = vrot.slane %v739_v41, %v1989_v25 }
 0x342   :  { %v795_v48 = vsel %vm248_vm0, %v794_v52, %v790_v1 }
 0x343   :  { %v733_v40 = vpop.xlane.xlu0 %732  ;;  %v834_v21 = vsel %vm317_vm3, %v795_v48, %v833_v7  ;;  %v743_v8 = vpop.xlane.xlu1 %742 }
 0x344   :  { %v808_v53 = vrot.slane %v733_v40, %v1993_v26  ;;  %v830_v30 = vrot.slane %v743_v8, %v1989_v25  ;;  %v835_v0 = vsel %vm319_vm4, %v804_v5, %v834_v21 }
 0x346   :  { %v813_v3 = vsel %vm248_vm0, %v812_v15, %v808_v53 }
 0x347   :  { %v737_v62 = vpop.xlane.xlu0 %736  ;;  %v836_v13 = vsel %vm321_vm5, %v813_v3, %v835_v0 }
 0x348   :  { %v817_v11 = vrot.slane %v737_v62, %v1993_v26 }
 0x34a   :  { %v822_v10 = vsel %vm248_vm0, %v821_v22, %v817_v11 }
 0x34b   :  { %v741_v29 = vpop.xlane.xlu0 %740  ;;  %v837_v33 = vsel %vm323_vm6, %v822_v10, %v836_v13 }
 0x34c   :  { %v826_v18 = vrot.slane %v741_v29, %v1993_v26 }
 0x34e   :  { %v831_v32 = vsel %vm248_vm0, %v830_v30, %v826_v18 }
 0x34f   :  { %v838_v34 = vsel %vm325_vm7, %v831_v32, %v837_v33 }
 0x350   :  { %v840_v36 = vsel %vm84_vm8, %v838_v34, -1e+30 }
 0x351   :  { %v841_v24 = vsel %vm329_vm9, %v840_v36, -inf }
 0x352   :  { %842 = vmax.xlane.f32.xlu0 %v841_v24 }
 0x35c   :  { %v2218_v37 = vpop.f32.mrf.mxu1 }
 0x35e   :  { %v1776_v1 = vpop.f32.mrf.mxu1 }
 0x360   :  { %v1050_v38 = vpop.f32.mrf.mxu1 }
 0x362   :  { %v1777_v41 = vpop.f32.mrf.mxu1 }
 0x3db   :  { %v843_v40 = vpop.xlane.xlu0 %842 }
 0x3dc   :  { %v844_v46 = vsub.f32 %v840_v36, %v843_v40 }
 0x3de   :  { %v845_v52 = vmul.f32 1.442695, %v844_v46 }
 0x3e0   :  { %1841 = vpow2.f32 %v845_v52 }
 0x3ed   :  { %v1842_v44 = vpop.eup %1841 }
 0x3ee   :  { %v847_v43 = vsel %vm329_vm9, %v1842_v44, 0.0 }
 0x3ef   :  { %848 = vadd.xlane.f32.xlu1 %v847_v43 }
 0x478   :  { %v849_v48 = vpop.xlane.xlu1 %848 }
 0x479   :  { %1843 = vrcp.f32 %v849_v48 }
 0x486   :  { %v1844_v53 = vpop.eup %1843 }
 0x487   :  { %v851_v57 = vmul.f32 %v1844_v53, %v1842_v44 }
 0x489   :  { %v855_v59 = vrot.slane %v851_v57, %v1903_v12  ;;  %v866_v62 = vrot.slane %v851_v57, %v2093_v50  ;;  %v877_v7 = vrot.slane %v851_v57, %v2096_v51  ;;  %v888_v15 = vrot.slane %v851_v57, %v2101_v55 }
 0x48a   :  { %v899_v11 = vrot.slane %v851_v57, %v2105_v58  ;;  %v910_v19 = vrot.slane %v851_v57, %v2109_v61  ;;  %v921_v21 = vrot.slane %v851_v57, %v2113_v2  ;;  %v932_v22 = vrot.slane %v851_v57, %v2117_v4 }
 0x48b   :  { %861 = vbcast.lane.b32.xlu1 %v855_v59, 264  ;;  %857 = vbcast.lane.b32.xlu0 %v855_v59, 256 }
 0x48f   :  { %868 = vbcast.lane.b32.xlu1 %v866_v62, 256  ;;  %879 = vbcast.lane.b32.xlu0 %v877_v7, 256 }
 0x493   :  { %872 = vbcast.lane.b32.xlu1 %v866_v62, 264  ;;  %890 = vbcast.lane.b32.xlu0 %v888_v15, 256 }
 0x497   :  { %883 = vbcast.lane.b32.xlu1 %v877_v7, 264  ;;  %901 = vbcast.lane.b32.xlu0 %v899_v11, 256 }
 0x49b   :  { %894 = vbcast.lane.b32.xlu1 %v888_v15, 264  ;;  %912 = vbcast.lane.b32.xlu0 %v910_v19, 256 }
 0x49f   :  { %905 = vbcast.lane.b32.xlu1 %v899_v11, 264  ;;  %923 = vbcast.lane.b32.xlu0 %v921_v21, 256 }
 0x4a3   :  { %916 = vbcast.lane.b32.xlu1 %v910_v19, 264  ;;  %934 = vbcast.lane.b32.xlu0 %v932_v22, 256 }
 0x4a7   :  { %927 = vbcast.lane.b32.xlu1 %v921_v21, 264 }
 0x4ab   :  { %938 = vbcast.lane.b32.xlu1 %v932_v22, 264 }
 0x4fd   :  { %v862_v8 = vpop.permute.xlu1 %861  ;;  %v858_v3 = vpop.permute.xlu0 %857 }
 0x4fe   :  { %v941_v0 = vmul.f32 %v1915_v20, %v862_v8  ;;  %v940_v13 = vmul.f32 %v1906_v14, %v858_v3 }
 0x500   :  { %v956_v38 = vadd.f32 %v941_v0, %v940_v13 }
 0x501   :  { %v869_v5 = vpop.permute.xlu1 %868  ;;  %v880_v10 = vpop.permute.xlu0 %879 }
 0x502   :  { %v942_v34 = vmul.f32 %v1919_v23, %v869_v5  ;;  %v944_v24 = vmul.f32 %v1939_v39, %v880_v10  ;;  %v957_v53 = vrot.slane %v956_v38, 4 }
 0x504   :  { %v958_v21 = vadd.f32 %v957_v53, %v956_v38 }
 0x505   :  { %v873_v29 = vpop.permute.xlu1 %872  ;;  %v891_v30 = vpop.permute.xlu0 %890 }
 0x506   :  { %v943_v18 = vmul.f32 %v1929_v31, %v873_v29  ;;  %v946_v46 = vmul.f32 %v1950_v47, %v891_v30  ;;  %v959_v13 = vrot.slane %v958_v21, 2 }
 0x508   :  { %v963_v1 = vadd.f32 %v943_v18, %v942_v34 }
 0x509   :  { %v884_v32 = vpop.permute.xlu1 %883  ;;  %v902_v33 = vpop.permute.xlu0 %901 }
 0x50a   :  { %v945_v36 = vmul.f32 %v1935_v35, %v884_v32  ;;  %v964_v43 = vrot.slane %v963_v1, 4  ;;  %v948_v62 = vmul.f32 %v1925_v28, %v902_v33 }
 0x50c   :  { %v970_v41 = vadd.f32 %v945_v36, %v944_v24  ;;  %v965_v11 = vadd.f32 %v964_v43, %v963_v1  ;;  %v960_v43 = vadd.f32 %v959_v13, %v958_v21 }
 0x50d   :  { %v895_v40 = vpop.permute.xlu1 %894  ;;  %v913_v44 = vpop.permute.xlu0 %912 }
 0x50e   :  { %v947_v52 = vmul.f32 %v1944_v42, %v895_v40  ;;  %v971_v57 = vrot.slane %v970_v41, 4  ;;  %v950_v29 = vmul.f32 %v1960_v54, %v913_v44  ;;  %v966_v18 = vrot.slane %v965_v11, 2 }
 0x510   :  { %v977_v48 = vadd.f32 %v947_v52, %v946_v46  ;;  %v972_v22 = vadd.f32 %v971_v57, %v970_v41  ;;  %v967_v46 = vadd.f32 %v966_v18, %v965_v11 }
 0x511   :  { %v906_v59 = vpop.permute.xlu1 %905  ;;  %v924_v8 = vpop.permute.xlu0 %923 }
 0x512   :  { %v978_v7 = vrot.slane %v977_v48, 4  ;;  %v949_v15 = vmul.f32 %v1912_v17, %v906_v59  ;;  %v973_v32 = vrot.slane %v972_v22, 2  ;;  %v952_v24 = vmul.f32 %v1970_v60, %v924_v8 }
 0x513   :  { %v968_v8 = vrot.slane %v967_v46, 1 }
 0x514   :  { %v984_v19 = vadd.f32 %v949_v15, %v948_v62  ;;  %v979_v5 = vadd.f32 %v978_v7, %v977_v48  ;;  %v974_v44 = vadd.f32 %v973_v32, %v972_v22 }
 0x515   :  { %v917_v3 = vpop.permute.xlu1 %916  ;;  %v935_v40 = vpop.permute.xlu0 %934  ;;  %v969_v13 = vadd.f32 %v968_v8, %v967_v46 }
 0x516   :  { %v985_v10 = vrot.slane %v984_v19, 4  ;;  %v951_v30 = vmul.f32 %v1955_v49, %v917_v3  ;;  %v980_v36 = vrot.slane %v979_v5, 2  ;;  %v954_v59 = vmul.f32 %v1980_v6, %v935_v40 }
 0x518   :  { %v986_v0 = vadd.f32 %v985_v10, %v984_v19  ;;  %v991_v33 = vadd.f32 %v951_v30, %v950_v29  ;;  %v981_v57 = vadd.f32 %v980_v36, %v979_v5  ;;  %v975_v29 = vrot.slane %v974_v44, 1 }
 0x519   :  { %v928_v34 = vpop.permute.xlu1 %927 }
 0x51a   :  { %v953_v1 = vmul.f32 %v1965_v56, %v928_v34  ;;  %v987_v38 = vrot.slane %v986_v0, 2  ;;  %v992_v41 = vrot.slane %v991_v33, 4  ;;  %v961_v34 = vrot.slane %v960_v43, 1 }
 0x51b   :  { %v982_v11 = vrot.slane %v981_v57, 1  ;;  %v976_v36 = vadd.f32 %v975_v29, %v974_v44 }
 0x51c   :  { %v998_v52 = vadd.f32 %v953_v1, %v952_v24  ;;  %v993_v48 = vadd.f32 %v992_v41, %v991_v33  ;;  %v988_v15 = vadd.f32 %v987_v38, %v986_v0  ;;  %v962_v24 = vadd.f32 %v961_v34, %v960_v43 }
 0x51d   :  { %v939_v53 = vpop.permute.xlu1 %938  ;;  %v983_v1 = vadd.f32 %v982_v11, %v981_v57  ;;  %v1048_v43 = vadd.f32 %v2142_v45, %v2218_v37 }
 0x51e   :  { %v999_v62 = vrot.slane %v998_v52, 4  ;;  %v955_v7 = vmul.f32 %v1975_v63, %v939_v53  ;;  %v994_v19 = vrot.slane %v993_v48, 2  ;;  %v989_v22 = vrot.slane %v988_v15, 1 }
 0x51f   :  { %v1061_v40 = vsel %vm313_vm1, %v969_v13, %v962_v24 }
 0x520   :  { %v1000_v3 = vadd.f32 %v999_v62, %v998_v52  ;;  %v1005_v10 = vadd.f32 %v955_v7, %v954_v59  ;;  %v995_v30 = vadd.f32 %v994_v19, %v993_v48  ;;  %v990_v38 = vadd.f32 %v989_v22, %v988_v15 }
 0x521   :  { %v1062_v48 = vsel %vm315_vm2, %v976_v36, %v1061_v40 }
 0x522   :  { %v1001_v18 = vrot.slane %v1000_v3, 2  ;;  %v1006_v21 = vrot.slane %v1005_v10, 4  ;;  %v996_v32 = vrot.slane %v995_v30, 1  ;;  %v1063_v62 = vsel %vm317_vm3, %v983_v1, %v1062_v48 }
 0x523   :  { %v1064_v46 = vsel %vm319_vm4, %v990_v38, %v1063_v62 }
 0x524   :  { %v1002_v5 = vadd.f32 %v1001_v18, %v1000_v3  ;;  %v1007_v33 = vadd.f32 %v1006_v21, %v1005_v10  ;;  %v997_v52 = vadd.f32 %v996_v32, %v995_v30 }
 0x526   :  { %v1003_v41 = vrot.slane %v1002_v5, 1  ;;  %v1008_v0 = vrot.slane %v1007_v33, 2  ;;  %v1065_v19 = vsel %vm321_vm5, %v997_v52, %v1064_v46 }
 0x528   :  { %v1009_v53 = vadd.f32 %v1008_v0, %v1007_v33  ;;  %v1004_v59 = vadd.f32 %v1003_v41, %v1002_v5 }
 0x52a   :  { %v1010_v7 = vrot.slane %v1009_v53, 1  ;;  %v1066_v57 = vsel %vm323_vm6, %v1004_v59, %v1065_v19 }
 0x52c   :  { %v1011_v44 = vadd.f32 %v1010_v7, %v1009_v53 }
 0x52e   :  { %v1067_v15 = vsel %vm325_vm7, %v1011_v44, %v1066_v57 }
 0x52f   :  { %v1069_v8 = vadd.f32 %v1067_v15, %v1048_v43 }
 0x531   :  { %v1476_v3 = vpack.c.bf16 %v1069_v8, %v1069_v8  ;;  %v1078_v10 = vrot.slane %v1069_v8, %v1896_v9  ;;  %v1071_v29 = vcombine.high %v1069_v8, %v1069_v8 }
 0x533   :  { %1795 = vmatmul.mubr.bf16.vlgmr.msra.gmra.mxu0 %v1476_v3  ;;  %v1094_v30 = vrot.slane %v1078_v10, %v1896_v9  ;;  %v1086_v34 = vcombine.high %v1078_v10, %v1078_v10  ;;  %v1085_v11 = vrot.slane %v1071_v29, %v1896_v9 }
 0x535   :  { %v1123_v18 = vrot.slane %v1094_v30, %v1903_v12  ;;  %v1116_v21 = vcombine.high %v1094_v30, %v1094_v30  ;;  %v1108_v45 = vrot.slane %v1086_v34, %v1896_v9  ;;  %v1101_v37 = vrot.slane %v1085_v11, %v1896_v9 }
 0x536   :  { %v1087_v33 = vcombine.high %v1085_v11, %v1085_v11 }
 0x537   :  { %v1161_v22 = vmul.f32 %v1915_v20, %v1123_v18  ;;  %v1160_v13 = vmul.f32 %v1906_v14, %v1123_v18  ;;  %v1131_v32 = vrot.slane %v1116_v21, %v1903_v12  ;;  %v1127_v5 = vrot.slane %v1108_v45, %v1903_v12 }
 0x538   :  { %v1139_v1 = vrot.slane %v1101_v37, %v1903_v12  ;;  %v1118_v41 = vcombine.high %v1108_v45, %v1108_v45  ;;  %v1115_v52 = vrot.slane %v1087_v33, %v1896_v9  ;;  %v1117_v62 = vcombine.high %v1101_v37, %v1101_v37 }
 0x539   :  { %1178 = vadd.xlane.f32.xlu1 %v1161_v22  ;;  %1176 = vadd.xlane.f32.xlu0 %v1160_v13  ;;  %v1165_v36 = vmul.f32 %v1935_v35, %v1131_v32  ;;  %v1162_v24 = vmul.f32 %v1919_v23, %v1127_v5  ;;  %v1163_v0 = vmul.f32 %v1929_v31, %v1127_v5 }
 0x53a   :  { %v1169_v38 = vmul.f32 %v1912_v17, %v1139_v1  ;;  %v1135_v40 = vrot.slane %v1118_v41, %v1903_v12  ;;  %v1164_v53 = vmul.f32 %v1939_v39, %v1131_v32  ;;  %v1143_v59 = vrot.slane %v1115_v52, %v1903_v12 }
 0x53b   :  { %v1168_v7 = vmul.f32 %v1925_v28, %v1139_v1  ;;  %v1147_v19 = vrot.slane %v1117_v62, %v1903_v12  ;;  %v1119_v44 = vcombine.high %v1115_v52, %v1115_v52 }
 0x53c   :  { %v1167_v48 = vmul.f32 %v1944_v42, %v1135_v40  ;;  %v1171_v46 = vmul.f32 %v1955_v49, %v1143_v59  ;;  %v1166_v9 = vmul.f32 %v1950_v47, %v1135_v40  ;;  %v1170_v15 = vmul.f32 %v1960_v54, %v1143_v59 }
 0x53d   :  { %1186 = vadd.xlane.f32.xlu1 %v1165_v36  ;;  %1180 = vadd.xlane.f32.xlu0 %v1162_v24  ;;  %v1173_v43 = vmul.f32 %v1965_v56, %v1147_v19  ;;  %v1151_v57 = vrot.slane %v1119_v44, %v1903_v12  ;;  %v1172_v3 = vmul.f32 %v1970_v60, %v1147_v19 }
 0x53f   :  { %v1175_v8 = vmul.f32 %v1975_v63, %v1151_v57  ;;  %v1174_v10 = vmul.f32 %v1980_v6, %v1151_v57 }
 0x541   :  { %1182 = vadd.xlane.f32.xlu0 %v1163_v0  ;;  %1194 = vadd.xlane.f32.xlu1 %v1169_v38 }
 0x545   :  { %1184 = vadd.xlane.f32.xlu0 %v1164_v53  ;;  %1190 = vadd.xlane.f32.xlu1 %v1167_v48 }
 0x549   :  { %1192 = vadd.xlane.f32.xlu0 %v1168_v7  ;;  %1198 = vadd.xlane.f32.xlu1 %v1171_v46 }
 0x54d   :  { %1188 = vadd.xlane.f32.xlu0 %v1166_v9  ;;  %1202 = vadd.xlane.f32.xlu1 %v1173_v43 }
 0x551   :  { %1196 = vadd.xlane.f32.xlu0 %v1170_v15  ;;  %1206 = vadd.xlane.f32.xlu1 %v1175_v8 }
 0x555   :  { %1200 = vadd.xlane.f32.xlu0 %v1172_v3 }
 0x559   :  { %1204 = vadd.xlane.f32.xlu0 %v1174_v10 }
 0x5c2   :  { %v1179_v29 = vpop.xlane.xlu1 %1178  ;;  %v1177_v30 = vpop.xlane.xlu0 %1176 }
 0x5c3   :  { %v1231_v36 = vrot.slane %v1179_v29, %v1989_v25  ;;  %v1227_v24 = vrot.slane %v1177_v30, %v1993_v26 }
 0x5c5   :  { %v1232_v59 = vsel %vm248_vm0, %v1231_v36, %v1227_v24 }
 0x5c6   :  { %v1187_v34 = vpop.xlane.xlu1 %1186  ;;  %v1181_v11 = vpop.xlane.xlu0 %1180 }
 0x5c7   :  { %v1236_v1 = vrot.slane %v1181_v11, %v1993_v26  ;;  %v1249_v0 = vrot.slane %v1187_v34, %v1989_v25 }
 0x5ca   :  { %v1183_v18 = vpop.xlane.xlu0 %1182  ;;  %v1195_v21 = vpop.xlane.xlu1 %1194 }
 0x5cb   :  { %v1240_v5 = vrot.slane %v1183_v18, %v1989_v25  ;;  %v1267_v15 = vrot.slane %v1195_v21, %v1989_v25 }
 0x5cd   :  { %v1241_v52 = vsel %vm248_vm0, %v1240_v5, %v1236_v1 }
 0x5ce   :  { %v1185_v45 = vpop.xlane.xlu0 %1184  ;;  %v1191_v37 = vpop.xlane.xlu1 %1190  ;;  %v1296_v46 = vsel %vm313_vm1, %v1241_v52, %v1232_v59 }
 0x5cf   :  { %v1245_v33 = vrot.slane %v1185_v45, %v1993_v26  ;;  %v1258_v53 = vrot.slane %v1191_v37, %v1989_v25 }
 0x5d1   :  { %v1250_v48 = vsel %vm248_vm0, %v1249_v0, %v1245_v33 }
 0x5d2   :  { %v1193_v22 = vpop.xlane.xlu0 %1192  ;;  %v1199_v13 = vpop.xlane.xlu1 %1198  ;;  %v1297_v9 = vsel %vm315_vm2, %v1250_v48, %v1296_v46 }
 0x5d3   :  { %v1263_v19 = vrot.slane %v1193_v22, %v1993_v26  ;;  %v1276_v43 = vrot.slane %v1199_v13, %v1989_v25 }
 0x5d5   :  { %v1268_v30 = vsel %vm248_vm0, %v1267_v15, %v1263_v19  ;;  %v1829_v19 = vld [vmem:[%s2394_s2 + $0x38] sm:$0xff]  }
 0x5d6   :  { %v1189_v32 = vpop.xlane.xlu0 %1188  ;;  %v1203_v38 = vpop.xlane.xlu1 %1202  ;;  %1799 = vmatpush3.bf16.msra.mxu1 %v1829_v19 }
 0x5d7   :  { %v1254_v41 = vrot.slane %v1189_v32, %v1993_v26  ;;  %v1285_v3 = vrot.slane %v1203_v38, %v1989_v25  ;;  %1800 = vmatprep.subr.bf16.mxu1 %v1851_v27 }
 0x5d9   :  { %v1259_v62 = vsel %vm248_vm0, %v1258_v53, %v1254_v41 }
 0x5da   :  { %v1197_v40 = vpop.xlane.xlu0 %1196  ;;  %v1298_v8 = vsel %vm317_vm3, %v1259_v62, %v1297_v9  ;;  %v1207_v10 = vpop.xlane.xlu1 %1206  ;;  %v1836_v9 = vld [vmem:[%s2394_s2] sm:$0xff]  }
 0x5db   :  { %v1272_v7 = vrot.slane %v1197_v40, %v1993_v26  ;;  %v1294_v18 = vrot.slane %v1207_v10, %v1989_v25  ;;  %v1299_v37 = vsel %vm319_vm4, %v1268_v30, %v1298_v8 }
 0x5dd   :  { %v1277_v29 = vsel %vm248_vm0, %v1276_v43, %v1272_v7 }
 0x5de   :  { %v1201_v44 = vpop.xlane.xlu0 %1200  ;;  %v1300_v21 = vsel %vm321_vm5, %v1277_v29, %v1299_v37 }
 0x5df   :  { %v1281_v57 = vrot.slane %v1201_v44, %v1993_v26  ;;  %v1835_v44 = vld [vmem:[%s2394_s2 + $0x8] sm:$0xff]  }
 0x5e1   :  { %v1286_v34 = vsel %vm248_vm0, %v1285_v3, %v1281_v57 }
 0x5e2   :  { %v1205_v11 = vpop.xlane.xlu0 %1204  ;;  %v1301_v13 = vsel %vm323_vm6, %v1286_v34, %v1300_v21 }
 0x5e3   :  { %v1290_v45 = vrot.slane %v1205_v11, %v1993_v26 }
 0x5e5   :  { %v1295_v22 = vsel %vm248_vm0, %v1294_v18, %v1290_v45 }
 0x5e6   :  { %v1302_v32 = vsel %vm325_vm7, %v1295_v22, %v1301_v13 }
 0x5e7   :  { %v1304_v5 = vsel %vm84_vm8, %v1302_v32, -1e+30 }
 0x5e8   :  { %v1305_v33 = vsel %vm329_vm9, %v1304_v5, -inf }
 0x5e9   :  { %1306 = vmax.xlane.f32.xlu0 %v1305_v33 }
 0x5f3   :  { %v2318_v36 = vpop.f32.mrf.mxu0 }
 0x5f5   :  { %v1796_v25 = vpop.f32.mrf.mxu0 }
 0x5f7   :  { %v1514_v26 = vpop.f32.mrf.mxu0 }
 0x5f9   :  { %v1797_v24 = vpop.f32.mrf.mxu0 }
 0x672   :  { %v1307_v1 = vpop.xlane.xlu0 %1306 }
 0x673   :  { %v1308_v41 = vsub.f32 %v1304_v5, %v1307_v1 }
 0x675   :  { %v1309_v0 = vmul.f32 1.442695, %v1308_v41 }
 0x677   :  { %1845 = vpow2.f32 %v1309_v0 }
 0x684   :  { %v1846_v38 = vpop.eup %1845 }
 0x685   :  { %v1311_v40 = vsel %vm329_vm9, %v1846_v38, 0.0 }
 0x686   :  { %1312 = vadd.xlane.f32.xlu1 %v1311_v40 }
 0x70f   :  { %v1313_v52 = vpop.xlane.xlu1 %1312 }
 0x710   :  { %1847 = vrcp.f32 %v1313_v52 }
 0x71d   :  { %v1848_v16 = vpop.eup %1847 }
 0x71e   :  { %v1315_v53 = vmul.f32 %v1848_v16, %v1846_v38 }
 0x720   :  { %v1319_v48 = vrot.slane %v1315_v53, %v1903_v12  ;;  %v1330_v59 = vrot.slane %v1315_v53, %v2093_v50  ;;  %v1341_v62 = vrot.slane %v1315_v53, %v2096_v51  ;;  %v1352_v7 = vrot.slane %v1315_v53, %v2101_v55  ;;  %v1830_v50 = vld [vmem:[%s2394_s2 + $0x30] sm:$0xff]   ;;  %v1831_v55 = vld [vmem:[%s2394_s2 + $0x28] sm:$0xff]  }
 0x721   :  { %v1363_v46 = vrot.slane %v1315_v53, %v2105_v58  ;;  %v1374_v12 = vrot.slane %v1315_v53, %v2109_v61  ;;  %1801 = vmatpush3.bf16.msra.mxu1 %v1830_v50  ;;  %v1385_v51 = vrot.slane %v1315_v53, %v2113_v2  ;;  %v1396_v58 = vrot.slane %v1315_v53, %v2117_v4  ;;  %v1832_v61 = vld [vmem:[%s2394_s2 + $0x20] sm:$0xff]   ;;  %v1833_v2 = vld [vmem:[%s2394_s2 + $0x18] sm:$0xff]   ;;  %v1834_v4 = vld [vmem:[%s2394_s2 + $0x10] sm:$0xff]  }
 0x722   :  { %1325 = vbcast.lane.b32.xlu1 %v1319_v48, 264  ;;  %1321 = vbcast.lane.b32.xlu0 %v1319_v48, 256 }
 0x723   :  { %1802 = vmatprep.subr.bf16.mxu1 %v1851_v27 }
 0x725   :  { %1803 = vmatpush3.bf16.msra.mxu1 %v1831_v55 }
 0x726   :  { %1332 = vbcast.lane.b32.xlu1 %v1330_v59, 256  ;;  %1343 = vbcast.lane.b32.xlu0 %v1341_v62, 256 }
 0x727   :  { %1804 = vmatprep.subr.bf16.mxu1 %v1851_v27 }
 0x729   :  { %1805 = vmatpush3.bf16.msra.mxu1 %v1832_v61 }
 0x72a   :  { %1336 = vbcast.lane.b32.xlu1 %v1330_v59, 264  ;;  %1354 = vbcast.lane.b32.xlu0 %v1352_v7, 256 }
 0x72b   :  { %1806 = vmatprep.subr.bf16.mxu1 %v1851_v27 }
 0x72d   :  { %1807 = vmatpush3.bf16.msra.mxu1 %v1833_v2 }
 0x72e   :  { %1347 = vbcast.lane.b32.xlu1 %v1341_v62, 264  ;;  %1365 = vbcast.lane.b32.xlu0 %v1363_v46, 256 }
 0x72f   :  { %1808 = vmatprep.subr.bf16.mxu1 %v1851_v27 }
 0x731   :  { %1809 = vmatpush3.bf16.msra.mxu1 %v1834_v4 }
 0x732   :  { %1358 = vbcast.lane.b32.xlu1 %v1352_v7, 264  ;;  %1376 = vbcast.lane.b32.xlu0 %v1374_v12, 256 }
 0x733   :  { %1810 = vmatprep.subr.bf16.mxu1 %v1851_v27 }
 0x735   :  { %1811 = vmatpush3.bf16.msra.mxu1 %v1835_v44 }
 0x736   :  { %1369 = vbcast.lane.b32.xlu1 %v1363_v46, 264  ;;  %1387 = vbcast.lane.b32.xlu0 %v1385_v51, 256 }
 0x737   :  { %1812 = vmatprep.subr.bf16.mxu1 %v1851_v27 }
 0x739   :  { %1813 = vmatpush3.bf16.msra.mxu1 %v1836_v9 }
 0x73a   :  { %1380 = vbcast.lane.b32.xlu1 %v1374_v12, 264  ;;  %1398 = vbcast.lane.b32.xlu0 %v1396_v58, 256 }
 0x73e   :  { %1391 = vbcast.lane.b32.xlu1 %v1385_v51, 264 }
 0x742   :  { %1402 = vbcast.lane.b32.xlu1 %v1396_v58, 264 }
 0x794   :  { %v1326_v43 = vpop.permute.xlu1 %1325  ;;  %v1322_v57 = vpop.permute.xlu0 %1321 }
 0x795   :  { %v1405_v30 = vmul.f32 %v1915_v20, %v1326_v43  ;;  %v1404_v34 = vmul.f32 %v1906_v14, %v1322_v57 }
 0x797   :  { %v1420_v22 = vadd.f32 %v1405_v30, %v1404_v34 }
 0x798   :  { %v1333_v15 = vpop.permute.xlu1 %1332  ;;  %v1344_v8 = vpop.permute.xlu0 %1343 }
 0x799   :  { %v1406_v45 = vmul.f32 %v1919_v23, %v1333_v15  ;;  %v1408_v27 = vmul.f32 %v1939_v39, %v1344_v8  ;;  %v1421_v14 = vrot.slane %v1420_v22, 4 }
 0x79b   :  { %v1422_v0 = vadd.f32 %v1421_v14, %v1420_v22 }
 0x79c   :  { %v1337_v3 = vpop.permute.xlu1 %1336  ;;  %v1355_v10 = vpop.permute.xlu0 %1354 }
 0x79d   :  { %v1407_v29 = vmul.f32 %v1929_v31, %v1337_v3  ;;  %v1410_v5 = vmul.f32 %v1950_v47, %v1355_v10  ;;  %v1423_v62 = vrot.slane %v1422_v0, 2 }
 0x79f   :  { %v1427_v21 = vadd.f32 %v1407_v29, %v1406_v45  ;;  %v1424_v2 = vadd.f32 %v1423_v62, %v1422_v0 }
 0x7a0   :  { %v1348_v11 = vpop.permute.xlu1 %1347  ;;  %v1366_v18 = vpop.permute.xlu0 %1365 }
 0x7a1   :  { %v1409_v37 = vmul.f32 %v1935_v35, %v1348_v11  ;;  %v1428_v20 = vrot.slane %v1427_v21, 4  ;;  %v1412_v23 = vmul.f32 %v1925_v28, %v1366_v18  ;;  %v1425_v30 = vrot.slane %v1424_v2, 1 }
 0x7a3   :  { %v1434_v13 = vadd.f32 %v1409_v37, %v1408_v27  ;;  %v1429_v39 = vadd.f32 %v1428_v20, %v1427_v21 }
 0x7a4   :  { %v1359_v32 = vpop.permute.xlu1 %1358  ;;  %v1377_v33 = vpop.permute.xlu0 %1376 }
 0x7a5   :  { %v1411_v31 = vmul.f32 %v1944_v42, %v1359_v32  ;;  %v1435_v26 = vrot.slane %v1434_v13, 4  ;;  %v1414_v42 = vmul.f32 %v1960_v54, %v1377_v33  ;;  %v1430_v48 = vrot.slane %v1429_v39, 2 }
 0x7a7   :  { %v1441_v25 = vadd.f32 %v1411_v31, %v1410_v5  ;;  %v1436_v38 = vadd.f32 %v1435_v26, %v1434_v13  ;;  %v1431_v58 = vadd.f32 %v1430_v48, %v1429_v39  ;;  %v1426_v13 = vadd.f32 %v1425_v30, %v1424_v2 }
 0x7a8   :  { %v1370_v24 = vpop.permute.xlu1 %1369  ;;  %v1388_v40 = vpop.permute.xlu0 %1387 }
 0x7a9   :  { %v1442_v1 = vrot.slane %v1441_v25, 4  ;;  %v1413_v35 = vmul.f32 %v1912_v17, %v1370_v24  ;;  %v1437_v7 = vrot.slane %v1436_v38, 2  ;;  %v1416_v17 = vmul.f32 %v1970_v60, %v1388_v40 }
 0x7aa   :  { %v1432_v60 = vrot.slane %v1431_v58, 1 }
 0x7ab   :  { %v1448_v41 = vadd.f32 %v1413_v35, %v1412_v23  ;;  %v1443_v47 = vadd.f32 %v1442_v1, %v1441_v25  ;;  %v1438_v54 = vadd.f32 %v1437_v7, %v1436_v38 }
 0x7ac   :  { %v1381_v52 = vpop.permute.xlu1 %1380  ;;  %v1399_v55 = vpop.permute.xlu0 %1398  ;;  %v1433_v37 = vadd.f32 %v1432_v60, %v1431_v58 }
 0x7ad   :  { %v1449_v16 = vrot.slane %v1448_v41, 4  ;;  %v1415_v53 = vmul.f32 %v1955_v49, %v1381_v52  ;;  %v1444_v19 = vrot.slane %v1443_v47, 2  ;;  %v1418_v9 = vmul.f32 %v1980_v6, %v1399_v55 }
 0x7ae   :  { %v1439_v10 = vrot.slane %v1438_v54, 1  ;;  %v1525_v33 = vsel %vm313_vm1, %v1433_v37, %v1426_v13 }
 0x7af   :  { %v1450_v59 = vadd.f32 %v1449_v16, %v1448_v41  ;;  %v1455_v28 = vadd.f32 %v1415_v53, %v1414_v42  ;;  %v1445_v44 = vadd.f32 %v1444_v19, %v1443_v47  ;;  %v1849_v41 = vld [vmem:[%s2393_s4] ss:$0 sm:$0xff] }
 0x7b0   :  { %v1392_v46 = vpop.permute.xlu1 %1391  ;;  %v1440_v6 = vadd.f32 %v1439_v10, %v1438_v54  ;;  %v1512_v0 = vadd.f32 %v1849_v41, %v2318_v36 }
 0x7b1   :  { %v1417_v12 = vmul.f32 %v1965_v56, %v1392_v46  ;;  %v1451_v50 = vrot.slane %v1450_v59, 2  ;;  %v1456_v51 = vrot.slane %v1455_v28, 4  ;;  %v1446_v34 = vrot.slane %v1445_v44, 1 }
 0x7b2   :  { %v1526_v14 = vsel %vm315_vm2, %v1440_v6, %v1525_v33 }
 0x7b3   :  { %v1462_v61 = vadd.f32 %v1417_v12, %v1416_v17  ;;  %v1457_v4 = vadd.f32 %v1456_v51, %v1455_v28  ;;  %v1452_v15 = vadd.f32 %v1451_v50, %v1450_v59  ;;  %v1447_v32 = vadd.f32 %v1446_v34, %v1445_v44 }
 0x7b4   :  { %v1403_v49 = vpop.permute.xlu1 %1402 }
 0x7b5   :  { %v1463_v43 = vrot.slane %v1462_v61, 4  ;;  %v1419_v57 = vmul.f32 %v1975_v63, %v1403_v49  ;;  %v1458_v8 = vrot.slane %v1457_v4, 2  ;;  %v1453_v45 = vrot.slane %v1452_v15, 1 }
 0x7b6   :  { %v1527_v24 = vsel %vm317_vm3, %v1447_v32, %v1526_v14 }
 0x7b7   :  { %v1464_v3 = vadd.f32 %v1463_v43, %v1462_v61  ;;  %v1469_v56 = vadd.f32 %v1419_v57, %v1418_v9  ;;  %v1459_v29 = vadd.f32 %v1458_v8, %v1457_v4  ;;  %v1454_v31 = vadd.f32 %v1453_v45, %v1452_v15 }
 0x7b9   :  { %v1465_v11 = vrot.slane %v1464_v3, 2  ;;  %v1470_v18 = vrot.slane %v1469_v56, 4  ;;  %v1460_v27 = vrot.slane %v1459_v29, 1  ;;  %v1528_v1 = vsel %vm319_vm4, %v1454_v31, %v1527_v24 }
 0x7bb   :  { %v1466_v21 = vadd.f32 %v1465_v11, %v1464_v3  ;;  %v1471_v22 = vadd.f32 %v1470_v18, %v1469_v56  ;;  %v1461_v20 = vadd.f32 %v1460_v27, %v1459_v29 }
 0x7bd   :  { %v1467_v63 = vrot.slane %v1466_v21, 1  ;;  %v1472_v5 = vrot.slane %v1471_v22, 2  ;;  %v1529_v35 = vsel %vm321_vm5, %v1461_v20, %v1528_v1 }
 0x7bf   :  { %v1473_v25 = vadd.f32 %v1472_v5, %v1471_v22  ;;  %v1468_v26 = vadd.f32 %v1467_v63, %v1466_v21 }
 0x7c1   :  { %v1474_v23 = vrot.slane %v1473_v25, 1  ;;  %v1530_v38 = vsel %vm323_vm6, %v1468_v26, %v1529_v35 }
 0x7c3   :  { %v1475_v39 = vadd.f32 %v1474_v23, %v1473_v25 }
 0x7c5   :  { %v1531_v40 = vsel %vm325_vm7, %v1475_v39, %v1530_v38 }
 0x7c6   :  { %v1533_v52 = vadd.f32 %v1531_v40, %v1512_v0 }
 0x7c8   :  { %v1536_v47 = vpack.c.bf16 %v1533_v52, %v1533_v52 }
 0x7ca   :  { %1815 = vmatmul.mubr.bf16.vlgmr.msra.gmra.mxu1 %v1536_v47 }
 0x88a   :  { %v1635_v16 = vpop.f32.mrf.mxu1 }
 0x88b   :  { %1641 = vst [vmem:[%s2395_s5] sm:$0xff] %v1635_v16 }
 0x88c   :  { %v1816_v42 = vpop.f32.mrf.mxu1 }
 0x88e   :  { %v1638_v53 = vpop.f32.mrf.mxu1 }
 0x890   :  { %v1817_v48 = vpop.f32.mrf.mxu1 }

</bundles_post_ra>
